<compile_context>
chip_gen: v5e
topology: v5e:2x2
jax: 0.10.0
libtpu: 0.0.40
codegen_flags: <defaults>
</compile_context>

<pallas_src>
import functools
import math

import jax
import jax.numpy as jnp
from jax.experimental import pallas as pl
from jax.experimental.pallas import tpu as pltpu

_LN_EPS = 1e-5  # PyTorch nn.LayerNorm default


def _layer_norm(x, w, b, eps):
    mu = jnp.mean(x, axis=-1, keepdims=True)
    var = jnp.mean((x - mu) ** 2, axis=-1, keepdims=True)
    return (x - mu) * jax.lax.rsqrt(var + eps) * w + b


def _transformer_block_kernel(x_ref, ln1w_ref, ln1b_ref, wqkv_ref, bqkv_ref,
                              wout_ref, bout_ref, ln2w_ref, ln2b_ref,
                              w1_ref, b1_ref, w2_ref, b2_ref, o_ref,
                              *, num_heads, head_dim, eps):
    # x_ref: (T, D) tile for one batch element (batch dim squeezed by BlockSpec).
    x = x_ref[...].astype(jnp.float32)
    T, D = x.shape

    # ---------- LayerNorm 1 ----------
    h = _layer_norm(x, ln1w_ref[...], ln1b_ref[...], eps)

    # ---------- multi-head self-attention ----------
    # TODO(synk): optional attention mask not implemented (forward default mask=None).
    scale = 1.0 / math.sqrt(head_dim)
    acc = jnp.zeros((T, D), jnp.float32)
    for hh in range(num_heads):
        # per-head projections: wqkv_ref is (3*H, D, hd), bqkv_ref is (3*H, 1, hd)
        q_h = jnp.dot(h, wqkv_ref[hh], preferred_element_type=jnp.float32) \
            + bqkv_ref[hh]                                               # (T, hd)
        k_h = jnp.dot(h, wqkv_ref[num_heads + hh],
                      preferred_element_type=jnp.float32) + bqkv_ref[num_heads + hh]
        v_h = jnp.dot(h, wqkv_ref[2 * num_heads + hh],
                      preferred_element_type=jnp.float32) + bqkv_ref[2 * num_heads + hh]

        # scores = q @ k^T / sqrt(hd)  (contract head_dim axes, no explicit transpose)
        s = jax.lax.dot_general(q_h, k_h, (((1,), (1,)), ((), ())),
                                preferred_element_type=jnp.float32) * scale  # (T, T)
        # numerically-stable softmax over keys
        s = s - jnp.max(s, axis=-1, keepdims=True)
        e = jnp.exp(s)
        p = e / jnp.sum(e, axis=-1, keepdims=True)

        o_h = jnp.dot(p, v_h, preferred_element_type=jnp.float32)           # (T, hd)
        # Fold the output projection per head:
        #   concat_h(o_h) @ Wout == sum_h o_h @ Wout[h*hd:(h+1)*hd, :]
        lo = hh * head_dim
        acc = acc + jnp.dot(o_h, wout_ref[lo:lo + head_dim, :],
                            preferred_element_type=jnp.float32)
    attn_out = acc + bout_ref[...]

    x1 = x + attn_out                                                        # residual 1

    # ---------- LayerNorm 2 + feed-forward ----------
    h2 = _layer_norm(x1, ln2w_ref[...], ln2b_ref[...], eps)
    f = jnp.maximum(
        jnp.dot(h2, w1_ref[...], preferred_element_type=jnp.float32) + b1_ref[...],
        0.0)
    ff_out = jnp.dot(f, w2_ref[...], preferred_element_type=jnp.float32) + b2_ref[...]

    o_ref[...] = (x1 + ff_out).astype(o_ref.dtype)                           # residual 2


def transformer_block(x, params, num_heads):
    """x: (B, T, D) float32.  params hold JAX-layout weights (in, out) + (1, out) biases."""
    B, T, D = x.shape
    assert D % num_heads == 0
    head_dim = D // num_heads
    Dff = params["w1"].shape[1]

    # Host-side (free) re-layout of the fused QKV params so every in-kernel access
    # is tile-aligned: (D, 3D) -> (3*H, D, hd); (1, 3D) -> (3*H, 1, hd).
    # Column order of wqkv matches torch's reshape(B,T,3,H,hd): j = s*H*hd + h*hd + d.
    wqkv_r = params["wqkv"].reshape(D, 3, num_heads, head_dim) \
                           .transpose(1, 2, 0, 3) \
                           .reshape(3 * num_heads, D, head_dim)
    bqkv_r = params["bqkv"].reshape(3 * num_heads, 1, head_dim)

    def _rep(shape):
        # full-array weight block; identical block index every grid step,
        # so Pallas only DMAs it once.
        return pl.BlockSpec(shape, lambda b, n=len(shape): (0,) * n)

    kernel = functools.partial(_transformer_block_kernel,
                               num_heads=num_heads, head_dim=head_dim, eps=_LN_EPS)

    return pl.pallas_call(
        kernel,
        out_shape=jax.ShapeDtypeStruct((B, T, D), x.dtype),
        grid=(B,),
        in_specs=[
            # one batch element per step; batch dim squeezed -> kernel sees (T, D)
            pl.BlockSpec((None, T, D), lambda b: (b, 0, 0)),
            _rep((1, D)), _rep((1, D)),                              # ln1 gamma, beta
            _rep((3 * num_heads, D, head_dim)),                      # qkv weights (per head)
            _rep((3 * num_heads, 1, head_dim)),                      # qkv biases  (per head)
            _rep((D, D)), _rep((1, D)),                              # out_proj weight, bias
            _rep((1, D)), _rep((1, D)),                              # ln2 gamma, beta
            _rep((D, Dff)), _rep((1, Dff)),                          # ff linear1 weight, bias
            _rep((Dff, D)), _rep((1, D)),                            # ff linear2 weight, bias
        ],
        out_specs=pl.BlockSpec((None, T, D), lambda b: (b, 0, 0)),
        compiler_params=pltpu.CompilerParams(
            dimension_semantics=("parallel",)),   # batch steps independent (v7x 2-TC sharding)
    )(x,
      params["ln1_w"], params["ln1_b"],
      wqkv_r, bqkv_r,
      params["wout"], params["bout"],
      params["ln2_w"], params["ln2_b"],
      params["w1"], params["b1"],
      params["w2"], params["b2"])


def transformer_block_ref(x, params, num_heads):
    """Pure-JAX reference mirroring the PyTorch TransformerBlock.forward."""
    B, T, D = x.shape
    hd = D // num_heads

    def ln(z, w, b):
        mu = jnp.mean(z, axis=-1, keepdims=True)
        var = jnp.mean((z - mu) ** 2, axis=-1, keepdims=True)
        return (z - mu) * jax.lax.rsqrt(var + _LN_EPS) * w + b

    h = ln(x, params["ln1_w"], params["ln1_b"])
    qkv = h @ params["wqkv"] + params["bqkv"]
    qkv = qkv.reshape(B, T, 3, num_heads, hd).transpose(2, 0, 3, 1, 4)
    q, k, v = qkv[0], qkv[1], qkv[2]
    s = jnp.einsum("bhqd,bhkd->bhqk", q, k) / math.sqrt(hd)
    p = jax.nn.softmax(s, axis=-1)
    o = jnp.einsum("bhqk,bhkd->bhqd", p, v)
    o = o.transpose(0, 2, 1, 3).reshape(B, T, D)
    x1 = x + (o @ params["wout"] + params["bout"])
    h2 = ln(x1, params["ln2_w"], params["ln2_b"])
    f = jnp.maximum(h2 @ params["w1"] + params["b1"], 0.0)
    return x1 + f @ params["w2"] + params["b2"]


if __name__ == "__main__":
    B, T, D, H = 2, 8, 32, 4               # batch=2, seq=8, embed_dim=32, num_heads=4
    Dff = 4 * D

    key = jax.random.PRNGKey(0)
    ks = jax.random.split(key, 13)
    x = jax.random.normal(ks[0], (B, T, D), dtype=jnp.float32)

    params = {
        "ln1_w": 1.0 + 0.1 * jax.random.normal(ks[1], (1, D), jnp.float32),
        "ln1_b": 0.1 * jax.random.normal(ks[2], (1, D), jnp.float32),
        "wqkv":  jax.random.normal(ks[3], (D, 3 * D), jnp.float32) / math.sqrt(D),
        "bqkv":  0.1 * jax.random.normal(ks[4], (1, 3 * D), jnp.float32),
        "wout":  jax.random.normal(ks[5], (D, D), jnp.float32) / math.sqrt(D),
        "bout":  0.1 * jax.random.normal(ks[6], (1, D), jnp.float32),
        "ln2_w": 1.0 + 0.1 * jax.random.normal(ks[7], (1, D), jnp.float32),
        "ln2_b": 0.1 * jax.random.normal(ks[8], (1, D), jnp.float32),
        "w1":    jax.random.normal(ks[9], (D, Dff), jnp.float32) / math.sqrt(D),
        "b1":    0.1 * jax.random.normal(ks[10], (1, Dff), jnp.float32),
        "w2":    jax.random.normal(ks[11], (Dff, D), jnp.float32) / math.sqrt(Dff),
        "b2":    0.1 * jax.random.normal(ks[12], (1, D), jnp.float32),
    }

    out = transformer_block(x, params, num_heads=H)
    out = jax.block_until_ready(out)

    ref = transformer_block_ref(x, params, H)
    assert out.shape == (B, T, D)
    assert jnp.allclose(out, ref, atol=2e-2, rtol=2e-2), (
        f"mismatch vs reference, max abs diff = {jnp.max(jnp.abs(out - ref))}")

    print("KERNEL_OK")
</pallas_src>

<mosaic_0001>
module attributes {stable_mosaic.version = 11 : i64} {
  func.func @_transformer_block_kernel(%arg0: i32, %arg1: memref<1x8x32xf32, #tpu.memory_space<vmem>>, %arg2: memref<1x32xf32, #tpu.memory_space<vmem>>, %arg3: memref<1x32xf32, #tpu.memory_space<vmem>>, %arg4: memref<12x32x8xf32, #tpu.memory_space<vmem>>, %arg5: memref<12x1x8xf32, #tpu.memory_space<vmem>>, %arg6: memref<32x32xf32, #tpu.memory_space<vmem>>, %arg7: memref<1x32xf32, #tpu.memory_space<vmem>>, %arg8: memref<1x32xf32, #tpu.memory_space<vmem>>, %arg9: memref<1x32xf32, #tpu.memory_space<vmem>>, %arg10: memref<32x128xf32, #tpu.memory_space<vmem>>, %arg11: memref<1x128xf32, #tpu.memory_space<vmem>>, %arg12: memref<128x32xf32, #tpu.memory_space<vmem>>, %arg13: memref<1x32xf32, #tpu.memory_space<vmem>>, %arg14: memref<1x8x32xf32, #tpu.memory_space<vmem>>) attributes {dimension_semantics = [#tpu.dimension_semantics<parallel>], iteration_bounds = array<i64: 2>, scalar_prefetch = 0 : i64, scratch_operands = 0 : i64, tpu.core_type = #tpu.core_type<tc>, window_params = [{transform_indices = @transform_0, window_bounds = array<i64: 1, 8, 32>}, {pipeline_mode = #tpu.pipeline_mode<synchronous>, transform_indices = @transform_1, window_bounds = array<i64: 1, 32>}, {pipeline_mode = #tpu.pipeline_mode<synchronous>, transform_indices = @transform_2, window_bounds = array<i64: 1, 32>}, {pipeline_mode = #tpu.pipeline_mode<synchronous>, transform_indices = @transform_3, window_bounds = array<i64: 12, 32, 8>}, {pipeline_mode = #tpu.pipeline_mode<synchronous>, transform_indices = @transform_4, window_bounds = array<i64: 12, 1, 8>}, {pipeline_mode = #tpu.pipeline_mode<synchronous>, transform_indices = @transform_5, window_bounds = array<i64: 32, 32>}, {pipeline_mode = #tpu.pipeline_mode<synchronous>, transform_indices = @transform_6, window_bounds = array<i64: 1, 32>}, {pipeline_mode = #tpu.pipeline_mode<synchronous>, transform_indices = @transform_7, window_bounds = array<i64: 1, 32>}, {pipeline_mode = #tpu.pipeline_mode<synchronous>, transform_indices = @transform_8, window_bounds = array<i64: 1, 32>}, {pipeline_mode = #tpu.pipeline_mode<synchronous>, transform_indices = @transform_9, window_bounds = array<i64: 32, 128>}, {pipeline_mode = #tpu.pipeline_mode<synchronous>, transform_indices = @transform_10, window_bounds = array<i64: 1, 128>}, {pipeline_mode = #tpu.pipeline_mode<synchronous>, transform_indices = @transform_11, window_bounds = array<i64: 128, 32>}, {pipeline_mode = #tpu.pipeline_mode<synchronous>, transform_indices = @transform_12, window_bounds = array<i64: 1, 32>}, {transform_indices = @transform_13, window_bounds = array<i64: 1, 8, 32>}]} {
    %c0 = arith.constant 0 : index
    %c0_0 = arith.constant 0 : index
    %c0_1 = arith.constant 0 : index
    %0 = vector.load %arg1[%c0, %c0_0, %c0_1] : memref<1x8x32xf32, #tpu.memory_space<vmem>>, vector<1x8x32xf32>
    %1 = vector.shape_cast %0 : vector<1x8x32xf32> to vector<8x32xf32>
    %c0_2 = arith.constant 0 : index
    %c0_3 = arith.constant 0 : index
    %2 = vector.load %arg2[%c0_2, %c0_3] : memref<1x32xf32, #tpu.memory_space<vmem>>, vector<1x32xf32>
    %c0_4 = arith.constant 0 : index
    %c0_5 = arith.constant 0 : index
    %3 = vector.load %arg3[%c0_4, %c0_5] : memref<1x32xf32, #tpu.memory_space<vmem>>, vector<1x32xf32>
    %cst = arith.constant dense<0.000000e+00> : vector<8xf32>
    %4 = vector.multi_reduction <add>, %1, %cst [1] : vector<8x32xf32> to vector<8xf32>
    %5 = vector.shape_cast %4 : vector<8xf32> to vector<8x1xf32>
    %cst_6 = arith.constant 3.200000e+01 : f32
    %6 = vector.broadcast %cst_6 : f32 to vector<8x1xf32>
    %7 = arith.divf %5, %6 : vector<8x1xf32>
    %8 = vector.broadcast %7 : vector<8x1xf32> to vector<8x32xf32>
    %9 = arith.subf %1, %8 : vector<8x32xf32>
    %10 = arith.mulf %9, %9 : vector<8x32xf32>
    %cst_7 = arith.constant dense<0.000000e+00> : vector<8xf32>
    %11 = vector.multi_reduction <add>, %10, %cst_7 [1] : vector<8x32xf32> to vector<8xf32>
    %12 = vector.shape_cast %11 : vector<8xf32> to vector<8x1xf32>
    %cst_8 = arith.constant 3.200000e+01 : f32
    %13 = vector.broadcast %cst_8 : f32 to vector<8x1xf32>
    %14 = arith.divf %12, %13 : vector<8x1xf32>
    %15 = vector.broadcast %7 : vector<8x1xf32> to vector<8x32xf32>
    %16 = arith.subf %1, %15 : vector<8x32xf32>
    %cst_9 = arith.constant 9.99999974E-6 : f32
    %17 = vector.broadcast %cst_9 : f32 to vector<8x1xf32>
    %18 = arith.addf %14, %17 : vector<8x1xf32>
    %19 = math.rsqrt %18 : vector<8x1xf32>
    %20 = vector.broadcast %19 : vector<8x1xf32> to vector<8x32xf32>
    %21 = arith.mulf %16, %20 : vector<8x32xf32>
    %22 = vector.broadcast %2 : vector<1x32xf32> to vector<8x32xf32>
    %23 = arith.mulf %21, %22 : vector<8x32xf32>
    %24 = vector.broadcast %3 : vector<1x32xf32> to vector<8x32xf32>
    %25 = arith.addf %23, %24 : vector<8x32xf32>
    %cst_10 = arith.constant 0.000000e+00 : f32
    %26 = vector.broadcast %cst_10 : f32 to vector<8x32xf32>
    %c0_11 = arith.constant 0 : index
    %c0_12 = arith.constant 0 : index
    %c0_13 = arith.constant 0 : index
    %27 = vector.load %arg4[%c0_11, %c0_12, %c0_13] : memref<12x32x8xf32, #tpu.memory_space<vmem>>, vector<1x32x8xf32>
    %28 = vector.shape_cast %27 : vector<1x32x8xf32> to vector<32x8xf32>
    %cst_14 = arith.constant dense<0.000000e+00> : vector<8x8xf32>
    %29 = tpu.matmul %25, %28, %cst_14 {dimension_numbers = #tpu.dot_dimension_numbers<[1], [0], [0], [1], [0, 0, 1, 1], [], []>} : vector<8x32xf32>, vector<32x8xf32>, vector<8x8xf32> -> vector<8x8xf32>
    %c0_15 = arith.constant 0 : index
    %c0_16 = arith.constant 0 : index
    %c0_17 = arith.constant 0 : index
    %30 = vector.load %arg5[%c0_15, %c0_16, %c0_17] : memref<12x1x8xf32, #tpu.memory_space<vmem>>, vector<1x1x8xf32>
    %31 = vector.shape_cast %30 : vector<1x1x8xf32> to vector<1x8xf32>
    %32 = vector.broadcast %31 : vector<1x8xf32> to vector<8x8xf32>
    %33 = arith.addf %29, %32 : vector<8x8xf32>
    %c4 = arith.constant 4 : index
    %c0_18 = arith.constant 0 : index
    %c0_19 = arith.constant 0 : index
    %34 = vector.load %arg4[%c4, %c0_18, %c0_19] : memref<12x32x8xf32, #tpu.memory_space<vmem>>, vector<1x32x8xf32>
    %35 = vector.shape_cast %34 : vector<1x32x8xf32> to vector<32x8xf32>
    %cst_20 = arith.constant dense<0.000000e+00> : vector<8x8xf32>
    %36 = tpu.matmul %25, %35, %cst_20 {dimension_numbers = #tpu.dot_dimension_numbers<[1], [0], [0], [1], [0, 0, 1, 1], [], []>} : vector<8x32xf32>, vector<32x8xf32>, vector<8x8xf32> -> vector<8x8xf32>
    %c4_21 = arith.constant 4 : index
    %c0_22 = arith.constant 0 : index
    %c0_23 = arith.constant 0 : index
    %37 = vector.load %arg5[%c4_21, %c0_22, %c0_23] : memref<12x1x8xf32, #tpu.memory_space<vmem>>, vector<1x1x8xf32>
    %38 = vector.shape_cast %37 : vector<1x1x8xf32> to vector<1x8xf32>
    %39 = vector.broadcast %38 : vector<1x8xf32> to vector<8x8xf32>
    %40 = arith.addf %36, %39 : vector<8x8xf32>
    %c8 = arith.constant 8 : index
    %c0_24 = arith.constant 0 : index
    %c0_25 = arith.constant 0 : index
    %41 = vector.load %arg4[%c8, %c0_24, %c0_25] : memref<12x32x8xf32, #tpu.memory_space<vmem>>, vector<1x32x8xf32>
    %42 = vector.shape_cast %41 : vector<1x32x8xf32> to vector<32x8xf32>
    %cst_26 = arith.constant dense<0.000000e+00> : vector<8x8xf32>
    %43 = tpu.matmul %25, %42, %cst_26 {dimension_numbers = #tpu.dot_dimension_numbers<[1], [0], [0], [1], [0, 0, 1, 1], [], []>} : vector<8x32xf32>, vector<32x8xf32>, vector<8x8xf32> -> vector<8x8xf32>
    %c8_27 = arith.constant 8 : index
    %c0_28 = arith.constant 0 : index
    %c0_29 = arith.constant 0 : index
    %44 = vector.load %arg5[%c8_27, %c0_28, %c0_29] : memref<12x1x8xf32, #tpu.memory_space<vmem>>, vector<1x1x8xf32>
    %45 = vector.shape_cast %44 : vector<1x1x8xf32> to vector<1x8xf32>
    %46 = vector.broadcast %45 : vector<1x8xf32> to vector<8x8xf32>
    %47 = arith.addf %43, %46 : vector<8x8xf32>
    %cst_30 = arith.constant dense<0.000000e+00> : vector<8x8xf32>
    %48 = tpu.matmul %33, %40, %cst_30 {dimension_numbers = #tpu.dot_dimension_numbers<[1], [1], [0], [0], [0, 0, 1, 0], [], []>} : vector<8x8xf32>, vector<8x8xf32>, vector<8x8xf32> -> vector<8x8xf32>
    %cst_31 = arith.constant 0.353553385 : f32
    %49 = vector.broadcast %cst_31 : f32 to vector<8x8xf32>
    %50 = arith.mulf %48, %49 : vector<8x8xf32>
    %cst_32 = arith.constant dense<0xFF800000> : vector<8xf32>
    %51 = vector.multi_reduction <maximumf>, %50, %cst_32 [1] : vector<8x8xf32> to vector<8xf32>
    %52 = vector.shape_cast %51 : vector<8xf32> to vector<8x1xf32>
    %53 = vector.broadcast %52 : vector<8x1xf32> to vector<8x8xf32>
    %54 = arith.subf %50, %53 : vector<8x8xf32>
    %55 = math.exp %54 : vector<8x8xf32>
    %cst_33 = arith.constant dense<0.000000e+00> : vector<8xf32>
    %56 = vector.multi_reduction <add>, %55, %cst_33 [1] : vector<8x8xf32> to vector<8xf32>
    %57 = vector.shape_cast %56 : vector<8xf32> to vector<8x1xf32>
    %58 = vector.broadcast %57 : vector<8x1xf32> to vector<8x8xf32>
    %59 = arith.divf %55, %58 : vector<8x8xf32>
    %cst_34 = arith.constant dense<0.000000e+00> : vector<8x8xf32>
    %60 = tpu.matmul %59, %47, %cst_34 {dimension_numbers = #tpu.dot_dimension_numbers<[1], [0], [0], [1], [0, 0, 1, 1], [], []>} : vector<8x8xf32>, vector<8x8xf32>, vector<8x8xf32> -> vector<8x8xf32>
    %c0_35 = arith.constant 0 : index
    %c0_36 = arith.constant 0 : index
    %61 = vector.load %arg6[%c0_35, %c0_36] : memref<32x32xf32, #tpu.memory_space<vmem>>, vector<8x32xf32>
    %cst_37 = arith.constant dense<0.000000e+00> : vector<8x32xf32>
    %62 = tpu.matmul %60, %61, %cst_37 {dimension_numbers = #tpu.dot_dimension_numbers<[1], [0], [0], [1], [0, 0, 1, 1], [], []>} : vector<8x8xf32>, vector<8x32xf32>, vector<8x32xf32> -> vector<8x32xf32>
    %63 = arith.addf %26, %62 : vector<8x32xf32>
    %c1 = arith.constant 1 : index
    %c0_38 = arith.constant 0 : index
    %c0_39 = arith.constant 0 : index
    %64 = vector.load %arg4[%c1, %c0_38, %c0_39] : memref<12x32x8xf32, #tpu.memory_space<vmem>>, vector<1x32x8xf32>
    %65 = vector.shape_cast %64 : vector<1x32x8xf32> to vector<32x8xf32>
    %cst_40 = arith.constant dense<0.000000e+00> : vector<8x8xf32>
    %66 = tpu.matmul %25, %65, %cst_40 {dimension_numbers = #tpu.dot_dimension_numbers<[1], [0], [0], [1], [0, 0, 1, 1], [], []>} : vector<8x32xf32>, vector<32x8xf32>, vector<8x8xf32> -> vector<8x8xf32>
    %c1_41 = arith.constant 1 : index
    %c0_42 = arith.constant 0 : index
    %c0_43 = arith.constant 0 : index
    %67 = vector.load %arg5[%c1_41, %c0_42, %c0_43] : memref<12x1x8xf32, #tpu.memory_space<vmem>>, vector<1x1x8xf32>
    %68 = vector.shape_cast %67 : vector<1x1x8xf32> to vector<1x8xf32>
    %69 = vector.broadcast %68 : vector<1x8xf32> to vector<8x8xf32>
    %70 = arith.addf %66, %69 : vector<8x8xf32>
    %c5 = arith.constant 5 : index
    %c0_44 = arith.constant 0 : index
    %c0_45 = arith.constant 0 : index
    %71 = vector.load %arg4[%c5, %c0_44, %c0_45] : memref<12x32x8xf32, #tpu.memory_space<vmem>>, vector<1x32x8xf32>
    %72 = vector.shape_cast %71 : vector<1x32x8xf32> to vector<32x8xf32>
    %cst_46 = arith.constant dense<0.000000e+00> : vector<8x8xf32>
    %73 = tpu.matmul %25, %72, %cst_46 {dimension_numbers = #tpu.dot_dimension_numbers<[1], [0], [0], [1], [0, 0, 1, 1], [], []>} : vector<8x32xf32>, vector<32x8xf32>, vector<8x8xf32> -> vector<8x8xf32>
    %c5_47 = arith.constant 5 : index
    %c0_48 = arith.constant 0 : index
    %c0_49 = arith.constant 0 : index
    %74 = vector.load %arg5[%c5_47, %c0_48, %c0_49] : memref<12x1x8xf32, #tpu.memory_space<vmem>>, vector<1x1x8xf32>
    %75 = vector.shape_cast %74 : vector<1x1x8xf32> to vector<1x8xf32>
    %76 = vector.broadcast %75 : vector<1x8xf32> to vector<8x8xf32>
    %77 = arith.addf %73, %76 : vector<8x8xf32>
    %c9 = arith.constant 9 : index
    %c0_50 = arith.constant 0 : index
    %c0_51 = arith.constant 0 : index
    %78 = vector.load %arg4[%c9, %c0_50, %c0_51] : memref<12x32x8xf32, #tpu.memory_space<vmem>>, vector<1x32x8xf32>
    %79 = vector.shape_cast %78 : vector<1x32x8xf32> to vector<32x8xf32>
    %cst_52 = arith.constant dense<0.000000e+00> : vector<8x8xf32>
    %80 = tpu.matmul %25, %79, %cst_52 {dimension_numbers = #tpu.dot_dimension_numbers<[1], [0], [0], [1], [0, 0, 1, 1], [], []>} : vector<8x32xf32>, vector<32x8xf32>, vector<8x8xf32> -> vector<8x8xf32>
    %c9_53 = arith.constant 9 : index
    %c0_54 = arith.constant 0 : index
    %c0_55 = arith.constant 0 : index
    %81 = vector.load %arg5[%c9_53, %c0_54, %c0_55] : memref<12x1x8xf32, #tpu.memory_space<vmem>>, vector<1x1x8xf32>
    %82 = vector.shape_cast %81 : vector<1x1x8xf32> to vector<1x8xf32>
    %83 = vector.broadcast %82 : vector<1x8xf32> to vector<8x8xf32>
    %84 = arith.addf %80, %83 : vector<8x8xf32>
    %cst_56 = arith.constant dense<0.000000e+00> : vector<8x8xf32>
    %85 = tpu.matmul %70, %77, %cst_56 {dimension_numbers = #tpu.dot_dimension_numbers<[1], [1], [0], [0], [0, 0, 1, 0], [], []>} : vector<8x8xf32>, vector<8x8xf32>, vector<8x8xf32> -> vector<8x8xf32>
    %cst_57 = arith.constant 0.353553385 : f32
    %86 = vector.broadcast %cst_57 : f32 to vector<8x8xf32>
    %87 = arith.mulf %85, %86 : vector<8x8xf32>
    %cst_58 = arith.constant dense<0xFF800000> : vector<8xf32>
    %88 = vector.multi_reduction <maximumf>, %87, %cst_58 [1] : vector<8x8xf32> to vector<8xf32>
    %89 = vector.shape_cast %88 : vector<8xf32> to vector<8x1xf32>
    %90 = vector.broadcast %89 : vector<8x1xf32> to vector<8x8xf32>
    %91 = arith.subf %87, %90 : vector<8x8xf32>
    %92 = math.exp %91 : vector<8x8xf32>
    %cst_59 = arith.constant dense<0.000000e+00> : vector<8xf32>
    %93 = vector.multi_reduction <add>, %92, %cst_59 [1] : vector<8x8xf32> to vector<8xf32>
    %94 = vector.shape_cast %93 : vector<8xf32> to vector<8x1xf32>
    %95 = vector.broadcast %94 : vector<8x1xf32> to vector<8x8xf32>
    %96 = arith.divf %92, %95 : vector<8x8xf32>
    %cst_60 = arith.constant dense<0.000000e+00> : vector<8x8xf32>
    %97 = tpu.matmul %96, %84, %cst_60 {dimension_numbers = #tpu.dot_dimension_numbers<[1], [0], [0], [1], [0, 0, 1, 1], [], []>} : vector<8x8xf32>, vector<8x8xf32>, vector<8x8xf32> -> vector<8x8xf32>
    %c8_61 = arith.constant 8 : index
    %c0_62 = arith.constant 0 : index
    %98 = vector.load %arg6[%c8_61, %c0_62] : memref<32x32xf32, #tpu.memory_space<vmem>>, vector<8x32xf32>
    %cst_63 = arith.constant dense<0.000000e+00> : vector<8x32xf32>
    %99 = tpu.matmul %97, %98, %cst_63 {dimension_numbers = #tpu.dot_dimension_numbers<[1], [0], [0], [1], [0, 0, 1, 1], [], []>} : vector<8x8xf32>, vector<8x32xf32>, vector<8x32xf32> -> vector<8x32xf32>
    %100 = arith.addf %63, %99 : vector<8x32xf32>
    %c2 = arith.constant 2 : index
    %c0_64 = arith.constant 0 : index
    %c0_65 = arith.constant 0 : index
    %101 = vector.load %arg4[%c2, %c0_64, %c0_65] : memref<12x32x8xf32, #tpu.memory_space<vmem>>, vector<1x32x8xf32>
    %102 = vector.shape_cast %101 : vector<1x32x8xf32> to vector<32x8xf32>
    %cst_66 = arith.constant dense<0.000000e+00> : vector<8x8xf32>
    %103 = tpu.matmul %25, %102, %cst_66 {dimension_numbers = #tpu.dot_dimension_numbers<[1], [0], [0], [1], [0, 0, 1, 1], [], []>} : vector<8x32xf32>, vector<32x8xf32>, vector<8x8xf32> -> vector<8x8xf32>
    %c2_67 = arith.constant 2 : index
    %c0_68 = arith.constant 0 : index
    %c0_69 = arith.constant 0 : index
    %104 = vector.load %arg5[%c2_67, %c0_68, %c0_69] : memref<12x1x8xf32, #tpu.memory_space<vmem>>, vector<1x1x8xf32>
    %105 = vector.shape_cast %104 : vector<1x1x8xf32> to vector<1x8xf32>
    %106 = vector.broadcast %105 : vector<1x8xf32> to vector<8x8xf32>
    %107 = arith.addf %103, %106 : vector<8x8xf32>
    %c6 = arith.constant 6 : index
    %c0_70 = arith.constant 0 : index
    %c0_71 = arith.constant 0 : index
    %108 = vector.load %arg4[%c6, %c0_70, %c0_71] : memref<12x32x8xf32, #tpu.memory_space<vmem>>, vector<1x32x8xf32>
    %109 = vector.shape_cast %108 : vector<1x32x8xf32> to vector<32x8xf32>
    %cst_72 = arith.constant dense<0.000000e+00> : vector<8x8xf32>
    %110 = tpu.matmul %25, %109, %cst_72 {dimension_numbers = #tpu.dot_dimension_numbers<[1], [0], [0], [1], [0, 0, 1, 1], [], []>} : vector<8x32xf32>, vector<32x8xf32>, vector<8x8xf32> -> vector<8x8xf32>
    %c6_73 = arith.constant 6 : index
    %c0_74 = arith.constant 0 : index
    %c0_75 = arith.constant 0 : index
    %111 = vector.load %arg5[%c6_73, %c0_74, %c0_75] : memref<12x1x8xf32, #tpu.memory_space<vmem>>, vector<1x1x8xf32>
    %112 = vector.shape_cast %111 : vector<1x1x8xf32> to vector<1x8xf32>
    %113 = vector.broadcast %112 : vector<1x8xf32> to vector<8x8xf32>
    %114 = arith.addf %110, %113 : vector<8x8xf32>
    %c10 = arith.constant 10 : index
    %c0_76 = arith.constant 0 : index
    %c0_77 = arith.constant 0 : index
    %115 = vector.load %arg4[%c10, %c0_76, %c0_77] : memref<12x32x8xf32, #tpu.memory_space<vmem>>, vector<1x32x8xf32>
    %116 = vector.shape_cast %115 : vector<1x32x8xf32> to vector<32x8xf32>
    %cst_78 = arith.constant dense<0.000000e+00> : vector<8x8xf32>
    %117 = tpu.matmul %25, %116, %cst_78 {dimension_numbers = #tpu.dot_dimension_numbers<[1], [0], [0], [1], [0, 0, 1, 1], [], []>} : vector<8x32xf32>, vector<32x8xf32>, vector<8x8xf32> -> vector<8x8xf32>
    %c10_79 = arith.constant 10 : index
    %c0_80 = arith.constant 0 : index
    %c0_81 = arith.constant 0 : index
    %118 = vector.load %arg5[%c10_79, %c0_80, %c0_81] : memref<12x1x8xf32, #tpu.memory_space<vmem>>, vector<1x1x8xf32>
    %119 = vector.shape_cast %118 : vector<1x1x8xf32> to vector<1x8xf32>
    %120 = vector.broadcast %119 : vector<1x8xf32> to vector<8x8xf32>
    %121 = arith.addf %117, %120 : vector<8x8xf32>
    %cst_82 = arith.constant dense<0.000000e+00> : vector<8x8xf32>
    %122 = tpu.matmul %107, %114, %cst_82 {dimension_numbers = #tpu.dot_dimension_numbers<[1], [1], [0], [0], [0, 0, 1, 0], [], []>} : vector<8x8xf32>, vector<8x8xf32>, vector<8x8xf32> -> vector<8x8xf32>
    %cst_83 = arith.constant 0.353553385 : f32
    %123 = vector.broadcast %cst_83 : f32 to vector<8x8xf32>
    %124 = arith.mulf %122, %123 : vector<8x8xf32>
    %cst_84 = arith.constant dense<0xFF800000> : vector<8xf32>
    %125 = vector.multi_reduction <maximumf>, %124, %cst_84 [1] : vector<8x8xf32> to vector<8xf32>
    %126 = vector.shape_cast %125 : vector<8xf32> to vector<8x1xf32>
    %127 = vector.broadcast %126 : vector<8x1xf32> to vector<8x8xf32>
    %128 = arith.subf %124, %127 : vector<8x8xf32>
    %129 = math.exp %128 : vector<8x8xf32>
    %cst_85 = arith.constant dense<0.000000e+00> : vector<8xf32>
    %130 = vector.multi_reduction <add>, %129, %cst_85 [1] : vector<8x8xf32> to vector<8xf32>
    %131 = vector.shape_cast %130 : vector<8xf32> to vector<8x1xf32>
    %132 = vector.broadcast %131 : vector<8x1xf32> to vector<8x8xf32>
    %133 = arith.divf %129, %132 : vector<8x8xf32>
    %cst_86 = arith.constant dense<0.000000e+00> : vector<8x8xf32>
    %134 = tpu.matmul %133, %121, %cst_86 {dimension_numbers = #tpu.dot_dimension_numbers<[1], [0], [0], [1], [0, 0, 1, 1], [], []>} : vector<8x8xf32>, vector<8x8xf32>, vector<8x8xf32> -> vector<8x8xf32>
    %c16 = arith.constant 16 : index
    %c0_87 = arith.constant 0 : index
    %135 = vector.load %arg6[%c16, %c0_87] : memref<32x32xf32, #tpu.memory_space<vmem>>, vector<8x32xf32>
    %cst_88 = arith.constant dense<0.000000e+00> : vector<8x32xf32>
    %136 = tpu.matmul %134, %135, %cst_88 {dimension_numbers = #tpu.dot_dimension_numbers<[1], [0], [0], [1], [0, 0, 1, 1], [], []>} : vector<8x8xf32>, vector<8x32xf32>, vector<8x32xf32> -> vector<8x32xf32>
    %137 = arith.addf %100, %136 : vector<8x32xf32>
    %c3 = arith.constant 3 : index
    %c0_89 = arith.constant 0 : index
    %c0_90 = arith.constant 0 : index
    %138 = vector.load %arg4[%c3, %c0_89, %c0_90] : memref<12x32x8xf32, #tpu.memory_space<vmem>>, vector<1x32x8xf32>
    %139 = vector.shape_cast %138 : vector<1x32x8xf32> to vector<32x8xf32>
    %cst_91 = arith.constant dense<0.000000e+00> : vector<8x8xf32>
    %140 = tpu.matmul %25, %139, %cst_91 {dimension_numbers = #tpu.dot_dimension_numbers<[1], [0], [0], [1], [0, 0, 1, 1], [], []>} : vector<8x32xf32>, vector<32x8xf32>, vector<8x8xf32> -> vector<8x8xf32>
    %c3_92 = arith.constant 3 : index
    %c0_93 = arith.constant 0 : index
    %c0_94 = arith.constant 0 : index
    %141 = vector.load %arg5[%c3_92, %c0_93, %c0_94] : memref<12x1x8xf32, #tpu.memory_space<vmem>>, vector<1x1x8xf32>
    %142 = vector.shape_cast %141 : vector<1x1x8xf32> to vector<1x8xf32>
    %143 = vector.broadcast %142 : vector<1x8xf32> to vector<8x8xf32>
    %144 = arith.addf %140, %143 : vector<8x8xf32>
    %c7 = arith.constant 7 : index
    %c0_95 = arith.constant 0 : index
    %c0_96 = arith.constant 0 : index
    %145 = vector.load %arg4[%c7, %c0_95, %c0_96] : memref<12x32x8xf32, #tpu.memory_space<vmem>>, vector<1x32x8xf32>
    %146 = vector.shape_cast %145 : vector<1x32x8xf32> to vector<32x8xf32>
    %cst_97 = arith.constant dense<0.000000e+00> : vector<8x8xf32>
    %147 = tpu.matmul %25, %146, %cst_97 {dimension_numbers = #tpu.dot_dimension_numbers<[1], [0], [0], [1], [0, 0, 1, 1], [], []>} : vector<8x32xf32>, vector<32x8xf32>, vector<8x8xf32> -> vector<8x8xf32>
    %c7_98 = arith.constant 7 : index
    %c0_99 = arith.constant 0 : index
    %c0_100 = arith.constant 0 : index
    %148 = vector.load %arg5[%c7_98, %c0_99, %c0_100] : memref<12x1x8xf32, #tpu.memory_space<vmem>>, vector<1x1x8xf32>
    %149 = vector.shape_cast %148 : vector<1x1x8xf32> to vector<1x8xf32>
    %150 = vector.broadcast %149 : vector<1x8xf32> to vector<8x8xf32>
    %151 = arith.addf %147, %150 : vector<8x8xf32>
    %c11 = arith.constant 11 : index
    %c0_101 = arith.constant 0 : index
    %c0_102 = arith.constant 0 : index
    %152 = vector.load %arg4[%c11, %c0_101, %c0_102] : memref<12x32x8xf32, #tpu.memory_space<vmem>>, vector<1x32x8xf32>
    %153 = vector.shape_cast %152 : vector<1x32x8xf32> to vector<32x8xf32>
    %cst_103 = arith.constant dense<0.000000e+00> : vector<8x8xf32>
    %154 = tpu.matmul %25, %153, %cst_103 {dimension_numbers = #tpu.dot_dimension_numbers<[1], [0], [0], [1], [0, 0, 1, 1], [], []>} : vector<8x32xf32>, vector<32x8xf32>, vector<8x8xf32> -> vector<8x8xf32>
    %c11_104 = arith.constant 11 : index
    %c0_105 = arith.constant 0 : index
    %c0_106 = arith.constant 0 : index
    %155 = vector.load %arg5[%c11_104, %c0_105, %c0_106] : memref<12x1x8xf32, #tpu.memory_space<vmem>>, vector<1x1x8xf32>
    %156 = vector.shape_cast %155 : vector<1x1x8xf32> to vector<1x8xf32>
    %157 = vector.broadcast %156 : vector<1x8xf32> to vector<8x8xf32>
    %158 = arith.addf %154, %157 : vector<8x8xf32>
    %cst_107 = arith.constant dense<0.000000e+00> : vector<8x8xf32>
    %159 = tpu.matmul %144, %151, %cst_107 {dimension_numbers = #tpu.dot_dimension_numbers<[1], [1], [0], [0], [0, 0, 1, 0], [], []>} : vector<8x8xf32>, vector<8x8xf32>, vector<8x8xf32> -> vector<8x8xf32>
    %cst_108 = arith.constant 0.353553385 : f32
    %160 = vector.broadcast %cst_108 : f32 to vector<8x8xf32>
    %161 = arith.mulf %159, %160 : vector<8x8xf32>
    %cst_109 = arith.constant dense<0xFF800000> : vector<8xf32>
    %162 = vector.multi_reduction <maximumf>, %161, %cst_109 [1] : vector<8x8xf32> to vector<8xf32>
    %163 = vector.shape_cast %162 : vector<8xf32> to vector<8x1xf32>
    %164 = vector.broadcast %163 : vector<8x1xf32> to vector<8x8xf32>
    %165 = arith.subf %161, %164 : vector<8x8xf32>
    %166 = math.exp %165 : vector<8x8xf32>
    %cst_110 = arith.constant dense<0.000000e+00> : vector<8xf32>
    %167 = vector.multi_reduction <add>, %166, %cst_110 [1] : vector<8x8xf32> to vector<8xf32>
    %168 = vector.shape_cast %167 : vector<8xf32> to vector<8x1xf32>
    %169 = vector.broadcast %168 : vector<8x1xf32> to vector<8x8xf32>
    %170 = arith.divf %166, %169 : vector<8x8xf32>
    %cst_111 = arith.constant dense<0.000000e+00> : vector<8x8xf32>
    %171 = tpu.matmul %170, %158, %cst_111 {dimension_numbers = #tpu.dot_dimension_numbers<[1], [0], [0], [1], [0, 0, 1, 1], [], []>} : vector<8x8xf32>, vector<8x8xf32>, vector<8x8xf32> -> vector<8x8xf32>
    %c24 = arith.constant 24 : index
    %c0_112 = arith.constant 0 : index
    %172 = vector.load %arg6[%c24, %c0_112] : memref<32x32xf32, #tpu.memory_space<vmem>>, vector<8x32xf32>
    %cst_113 = arith.constant dense<0.000000e+00> : vector<8x32xf32>
    %173 = tpu.matmul %171, %172, %cst_113 {dimension_numbers = #tpu.dot_dimension_numbers<[1], [0], [0], [1], [0, 0, 1, 1], [], []>} : vector<8x8xf32>, vector<8x32xf32>, vector<8x32xf32> -> vector<8x32xf32>
    %174 = arith.addf %137, %173 : vector<8x32xf32>
    %c0_114 = arith.constant 0 : index
    %c0_115 = arith.constant 0 : index
    %175 = vector.load %arg7[%c0_114, %c0_115] : memref<1x32xf32, #tpu.memory_space<vmem>>, vector<1x32xf32>
    %176 = vector.broadcast %175 : vector<1x32xf32> to vector<8x32xf32>
    %177 = arith.addf %174, %176 : vector<8x32xf32>
    %178 = arith.addf %1, %177 : vector<8x32xf32>
    %c0_116 = arith.constant 0 : index
    %c0_117 = arith.constant 0 : index
    %179 = vector.load %arg8[%c0_116, %c0_117] : memref<1x32xf32, #tpu.memory_space<vmem>>, vector<1x32xf32>
    %c0_118 = arith.constant 0 : index
    %c0_119 = arith.constant 0 : index
    %180 = vector.load %arg9[%c0_118, %c0_119] : memref<1x32xf32, #tpu.memory_space<vmem>>, vector<1x32xf32>
    %cst_120 = arith.constant dense<0.000000e+00> : vector<8xf32>
    %181 = vector.multi_reduction <add>, %178, %cst_120 [1] : vector<8x32xf32> to vector<8xf32>
    %182 = vector.shape_cast %181 : vector<8xf32> to vector<8x1xf32>
    %cst_121 = arith.constant 3.200000e+01 : f32
    %183 = vector.broadcast %cst_121 : f32 to vector<8x1xf32>
    %184 = arith.divf %182, %183 : vector<8x1xf32>
    %185 = vector.broadcast %184 : vector<8x1xf32> to vector<8x32xf32>
    %186 = arith.subf %178, %185 : vector<8x32xf32>
    %187 = arith.mulf %186, %186 : vector<8x32xf32>
    %cst_122 = arith.constant dense<0.000000e+00> : vector<8xf32>
    %188 = vector.multi_reduction <add>, %187, %cst_122 [1] : vector<8x32xf32> to vector<8xf32>
    %189 = vector.shape_cast %188 : vector<8xf32> to vector<8x1xf32>
    %cst_123 = arith.constant 3.200000e+01 : f32
    %190 = vector.broadcast %cst_123 : f32 to vector<8x1xf32>
    %191 = arith.divf %189, %190 : vector<8x1xf32>
    %192 = vector.broadcast %184 : vector<8x1xf32> to vector<8x32xf32>
    %193 = arith.subf %178, %192 : vector<8x32xf32>
    %cst_124 = arith.constant 9.99999974E-6 : f32
    %194 = vector.broadcast %cst_124 : f32 to vector<8x1xf32>
    %195 = arith.addf %191, %194 : vector<8x1xf32>
    %196 = math.rsqrt %195 : vector<8x1xf32>
    %197 = vector.broadcast %196 : vector<8x1xf32> to vector<8x32xf32>
    %198 = arith.mulf %193, %197 : vector<8x32xf32>
    %199 = vector.broadcast %179 : vector<1x32xf32> to vector<8x32xf32>
    %200 = arith.mulf %198, %199 : vector<8x32xf32>
    %201 = vector.broadcast %180 : vector<1x32xf32> to vector<8x32xf32>
    %202 = arith.addf %200, %201 : vector<8x32xf32>
    %c0_125 = arith.constant 0 : index
    %c0_126 = arith.constant 0 : index
    %203 = vector.load %arg10[%c0_125, %c0_126] : memref<32x128xf32, #tpu.memory_space<vmem>>, vector<32x128xf32>
    %cst_127 = arith.constant dense<0.000000e+00> : vector<8x128xf32>
    %204 = tpu.matmul %202, %203, %cst_127 {dimension_numbers = #tpu.dot_dimension_numbers<[1], [0], [0], [1], [0, 0, 1, 1], [], []>} : vector<8x32xf32>, vector<32x128xf32>, vector<8x128xf32> -> vector<8x128xf32>
    %c0_128 = arith.constant 0 : index
    %c0_129 = arith.constant 0 : index
    %205 = vector.load %arg11[%c0_128, %c0_129] : memref<1x128xf32, #tpu.memory_space<vmem>>, vector<1x128xf32>
    %206 = vector.broadcast %205 : vector<1x128xf32> to vector<8x128xf32>
    %207 = arith.addf %204, %206 : vector<8x128xf32>
    %cst_130 = arith.constant 0.000000e+00 : f32
    %208 = vector.broadcast %cst_130 : f32 to vector<8x128xf32>
    %209 = arith.maximumf %207, %208 : vector<8x128xf32>
    %c0_131 = arith.constant 0 : index
    %c0_132 = arith.constant 0 : index
    %210 = vector.load %arg12[%c0_131, %c0_132] : memref<128x32xf32, #tpu.memory_space<vmem>>, vector<128x32xf32>
    %cst_133 = arith.constant dense<0.000000e+00> : vector<8x32xf32>
    %211 = tpu.matmul %209, %210, %cst_133 {dimension_numbers = #tpu.dot_dimension_numbers<[1], [0], [0], [1], [0, 0, 1, 1], [], []>} : vector<8x128xf32>, vector<128x32xf32>, vector<8x32xf32> -> vector<8x32xf32>
    %c0_134 = arith.constant 0 : index
    %c0_135 = arith.constant 0 : index
    %212 = vector.load %arg13[%c0_134, %c0_135] : memref<1x32xf32, #tpu.memory_space<vmem>>, vector<1x32xf32>
    %213 = vector.broadcast %212 : vector<1x32xf32> to vector<8x32xf32>
    %214 = arith.addf %211, %213 : vector<8x32xf32>
    %215 = arith.addf %178, %214 : vector<8x32xf32>
    %c0_136 = arith.constant 0 : index
    %c0_137 = arith.constant 0 : index
    %c0_138 = arith.constant 0 : index
    %216 = vector.load %arg14[%c0_136, %c0_137, %c0_138] : memref<1x8x32xf32, #tpu.memory_space<vmem>>, vector<1x8x32xf32>
    %217 = vector.shape_cast %216 : vector<1x8x32xf32> to vector<8x32xf32>
    %218 = vector.shape_cast %215 : vector<8x32xf32> to vector<1x8x32xf32>
    tpu.vector_store %arg14[%c0_136, %c0_137, %c0_138], %218 {strides = array<i32>} : memref<1x8x32xf32, #tpu.memory_space<vmem>>, vector<1x8x32xf32>,
    return
  }
  func.func @transform_0(%arg0: i32) -> (i32, i32, i32) {
    %c0_i32 = arith.constant 0 : i32
    %c0_i32_0 = arith.constant 0 : i32
    %c0_i32_1 = arith.constant 0 : i32
    return %arg0, %c0_i32, %c0_i32_0 : i32, i32, i32
  }
  func.func @transform_1(%arg0: i32) -> (i32, i32) {
    %c0_i32 = arith.constant 0 : i32
    %c0_i32_0 = arith.constant 0 : i32
    %c0_i32_1 = arith.constant 0 : i32
    return %c0_i32, %c0_i32_0 : i32, i32
  }
  func.func @transform_2(%arg0: i32) -> (i32, i32) {
    %c0_i32 = arith.constant 0 : i32
    %c0_i32_0 = arith.constant 0 : i32
    %c0_i32_1 = arith.constant 0 : i32
    return %c0_i32, %c0_i32_0 : i32, i32
  }
  func.func @transform_3(%arg0: i32) -> (i32, i32, i32) {
    %c0_i32 = arith.constant 0 : i32
    %c0_i32_0 = arith.constant 0 : i32
    %c0_i32_1 = arith.constant 0 : i32
    %c0_i32_2 = arith.constant 0 : i32
    return %c0_i32, %c0_i32_0, %c0_i32_1 : i32, i32, i32
  }
  func.func @transform_4(%arg0: i32) -> (i32, i32, i32) {
    %c0_i32 = arith.constant 0 : i32
    %c0_i32_0 = arith.constant 0 : i32
    %c0_i32_1 = arith.constant 0 : i32
    %c0_i32_2 = arith.constant 0 : i32
    return %c0_i32, %c0_i32_0, %c0_i32_1 : i32, i32, i32
  }
  func.func @transform_5(%arg0: i32) -> (i32, i32) {
    %c0_i32 = arith.constant 0 : i32
    %c0_i32_0 = arith.constant 0 : i32
    %c0_i32_1 = arith.constant 0 : i32
    return %c0_i32, %c0_i32_0 : i32, i32
  }
  func.func @transform_6(%arg0: i32) -> (i32, i32) {
    %c0_i32 = arith.constant 0 : i32
    %c0_i32_0 = arith.constant 0 : i32
    %c0_i32_1 = arith.constant 0 : i32
    return %c0_i32, %c0_i32_0 : i32, i32
  }
  func.func @transform_7(%arg0: i32) -> (i32, i32) {
    %c0_i32 = arith.constant 0 : i32
    %c0_i32_0 = arith.constant 0 : i32
    %c0_i32_1 = arith.constant 0 : i32
    return %c0_i32, %c0_i32_0 : i32, i32
  }
  func.func @transform_8(%arg0: i32) -> (i32, i32) {
    %c0_i32 = arith.constant 0 : i32
    %c0_i32_0 = arith.constant 0 : i32
    %c0_i32_1 = arith.constant 0 : i32
    return %c0_i32, %c0_i32_0 : i32, i32
  }
  func.func @transform_9(%arg0: i32) -> (i32, i32) {
    %c0_i32 = arith.constant 0 : i32
    %c0_i32_0 = arith.constant 0 : i32
    %c0_i32_1 = arith.constant 0 : i32
    return %c0_i32, %c0_i32_0 : i32, i32
  }
  func.func @transform_10(%arg0: i32) -> (i32, i32) {
    %c0_i32 = arith.constant 0 : i32
    %c0_i32_0 = arith.constant 0 : i32
    %c0_i32_1 = arith.constant 0 : i32
    return %c0_i32, %c0_i32_0 : i32, i32
  }
  func.func @transform_11(%arg0: i32) -> (i32, i32) {
    %c0_i32 = arith.constant 0 : i32
    %c0_i32_0 = arith.constant 0 : i32
    %c0_i32_1 = arith.constant 0 : i32
    return %c0_i32, %c0_i32_0 : i32, i32
  }
  func.func @transform_12(%arg0: i32) -> (i32, i32) {
    %c0_i32 = arith.constant 0 : i32
    %c0_i32_0 = arith.constant 0 : i32
    %c0_i32_1 = arith.constant 0 : i32
    return %c0_i32, %c0_i32_0 : i32, i32
  }
  func.func @transform_13(%arg0: i32) -> (i32, i32, i32) {
    %c0_i32 = arith.constant 0 : i32
    %c0_i32_0 = arith.constant 0 : i32
    %c0_i32_1 = arith.constant 0 : i32
    return %arg0, %c0_i32, %c0_i32_0 : i32, i32, i32
  }
}

</mosaic_0001>

<bundles_post_ra>
// kernel: tpu_custom_call.1
= control target key start
LH: loop header
LB: loop body
LE: loop exit
PB: predicated region body
PF: predicated region fallthrough
CT: control target
= control target key end

     0   :  { %s2160_s0 = inlined_call_operand.vmem [shape: f32[2,8,32], index: 0, kind: input, shape index: {}]   ;;  %s2161_s1 = inlined_call_operand.vmem [shape: f32[1,32], index: 1, kind: input, shape index: {}]   ;;  %s2162_s2 = inlined_call_operand.vmem [shape: f32[1,32], index: 2, kind: input, shape index: {}]   ;;  %s2163_s3 = inlined_call_operand.vmem [shape: f32[12,32,8], index: 3, kind: input, shape index: {}]   ;;  %s2164_s4 = inlined_call_operand.vmem [shape: f32[12,1,8], index: 4, kind: input, shape index: {}]   ;;  %s2165_s5 = inlined_call_operand.vmem [shape: f32[32,32], index: 5, kind: input, shape index: {}]   ;;  %s2166_s6 = inlined_call_operand.vmem [shape: f32[1,32], index: 6, kind: input, shape index: {}]   ;;  %s2167_s7 = inlined_call_operand.vmem [shape: f32[1,32], index: 7, kind: input, shape index: {}]   ;;  %s2168_s8 = inlined_call_operand.vmem [shape: f32[1,32], index: 8, kind: input, shape index: {}]   ;;  %s2169_s9 = inlined_call_operand.vmem [shape: f32[32,128], index: 9, kind: input, shape index: {}]   ;;  %s2170_s10 = inlined_call_operand.vmem [shape: f32[1,128], index: 10, kind: input, shape index: {}]   ;;  %s2171_s11 = inlined_call_operand.vmem [shape: f32[128,32], index: 11, kind: input, shape index: {}]   ;;  %s2172_s12 = inlined_call_operand.vmem [shape: f32[1,32], index: 12, kind: input, shape index: {}]   ;;  %s2173_s13 = inlined_call_operand.hbm [shape: f32[2,8,32], index: 13, kind: output, shape index: {}]  }
   0x1   :  { %2174 = sst [smem:[#allocation6_spill]] %s2160_s0 }
   0x2   :  { %2175 = sst [smem:[#allocation7_spill]] %s2161_s1 }
   0x3   :  { %2176 = sst [smem:[#allocation8_spill]] %s2162_s2 }
   0x4   :  { %18 = vsyncpa [#allocation3], 0 }
   0x5   :  { %20 = vsyncpa [#allocation3 + $0x1], 0  ;;  %s1730_s25 = smov 0   ;;  %s1732_s26 = smov 0  }
   0x6   :  { %s1734_s27 = smov 0   ;;  %s1736_s28 = smov 0  }
   0x7 LB: > { %s1751_s29 = sadd.s32 4294967295, %s1657_s28   ;;  %s1420_s30 = sadd.s32 4294967294, %s1657_s28   ;;  %s1657_s28 = sphi %s1736_s28, %s2187_s28   ;;  %s1653_s27 = sphi %s1734_s27, %s2186_s27   ;;  %s1649_s26 = sphi %s1732_s26, %s2185_s26   ;;  %s1645_s25 = sphi %s1730_s25, %s2184_s25  }
   0x8   : > { %s1755_s14 = sadd.s32 1, %s1657_s28   ;;  %s311_s15 = sadd.s32 1, %s1653_s27 }
   0x9   : > { %s308_s16 = ssub.s32 %s1657_s28, %s1755_s14  ;;  %p321_p0 = scmp.ne.s32.totalorder %s1653_s27, %s1649_s26 }
   0xa   : > { %p309_p1 = scmp.eq.s32.totalorder %s308_s16, 0  ;;  %p322_p2 = scmp.eq.s32.totalorder %s1751_s29, 1 }
   0xb   : > { %p327_p3 = scmp.ne.s32.totalorder %s1649_s26, %s1645_s25  ;;  %p328_p4 = scmp.eq.s32.totalorder %s1420_s30, 1 }
   0xc   : > { %s1766_s17 = scalar_select %p309_p1, %s1653_s27, %s311_s15  }
   0xd   : > { %p1768_p5 = por %p322_p2, %p321_p0  ;;  %p1772_p6 = por %p328_p4, %p327_p3 }
   0xe   : > { %2177 = sst [smem:[#allocation5_spill]] %s1766_s17  ;;  %p1423_p7 = scmp.ge.s32.totalorder %s1657_s28, 1 }
   0xf   : > { %p389_p8 = scmp.lt.s32.totalorder %s1657_s28, 3 }
  0x11   : > { %p390_p9 = pnand %p1423_p7, %p389_p8 }
  0x12   : > { %p432_p10 = scmp.lt.s32.totalorder (!%p390_p9), %s1751_s29, 1  ;;  %s2180_s0 = sld [smem:[#allocation6_spill]] (!%p390_p9) }
  0x13   : > { %393 = sbr.rel (%p390_p9) target bundleno = 3110 (0xc26), region = 72  ;;  %s2181_s1 = sld [smem:[#allocation7_spill]] (!%p390_p9) }
  0x14   : > { %s2182_s2 = sld [smem:[#allocation8_spill]] (!%p390_p9)  ;;  %s429_s30 = sand.u32 (!%p390_p9), 1, %s1649_s26  }
  0x15   : > { %s1424_s15 = sshll.u32 (!%p390_p9), %s429_s30, 3  ;;  %s1511_s16 = sshll.u32 (!%p390_p9), %s1751_s29, 3 }
  0x16   : > { %s1356_s23 = scalar_lea.hbm (!%p390_p9), %s2173_s13, %s1511_s16 }
  0x17   : > { %s1360_s17 = sshll.u32 (!%p390_p9), %s1356_s23, 4  ;;  %s1361_s17 = int_to_ptr.hbm [resolvable:$true] %s1360_s17 }
  0x18   : > { %s433_s20 = scalar_select %p432_p10, %s1751_s29, 1  ;;  %vm439_vm0 = vcmask 261120   ;;  %v1659_v2 = vmov 32.0   ;;  %v480_v14 = vld [vmem:[%s2163_s3 + $0x18] sm:$0xff]  ;;  %v479_v16 = vld [vmem:[%s2163_s3 + $0x10] sm:$0xff]  ;;  %v478_v18 = vld [vmem:[%s2163_s3 + $0x8] sm:$0xff] }
  0x19   : > { %1573 = vrcp.f32 %v1659_v2  ;;  %v1436_v15 = vld [vmem:[%s2163_s3 + $0x118] sm:$0xff]  ;;  %500 = vmatpush.msra.mxu1 %v480_v14  ;;  %v1435_v17 = vld [vmem:[%s2163_s3 + $0x110] sm:$0xff]  ;;  %v1434_v19 = vld [vmem:[%s2163_s3 + $0x108] sm:$0xff]  ;;  %vm568_vm5 = vcmask 64512   ;;  %s1346_s29 = scalar_lea.sflag [#allocation3], %s429_s30 }
  0x1a   : > { %s1425_s21 = sshll.u32 %s433_s20, 3  ;;  %560 = vmatpush.msra.mxu2 %v1436_v15  ;;  %v477_v20 = vld [vmem:[%s2163_s3] sm:$0xff]  ;;  %v1430_v22 = vld [vmem:[%s2163_s3 + $0x98] sm:$0xff]  ;;  %v1429_v24 = vld [vmem:[%s2163_s3 + $0x90] sm:$0xff] }
  0x1b   : > { %s435_s24 = scalar_lea.vmem %s2180_s0, %s1425_s21  ;;  %501 = vmatpush.msra.mxu1 %v479_v16  ;;  %v1433_v21 = vld [vmem:[%s2163_s3 + $0x100] sm:$0xff]  ;;  %v1445_v23 = vld [vmem:[%s2163_s3 + $0x38] sm:$0xff]  ;;  %v1444_v25 = vld [vmem:[%s2163_s3 + $0x30] sm:$0xff] }
  0x1c   : > { %v1783_v0 = vld [vmem:[%s435_s24] sm:$0xff]  ;;  %561 = vmatpush.msra.mxu2 %v1435_v17  ;;  %v1428_v26 = vld [vmem:[%s2163_s3 + $0x88] sm:$0xff]  ;;  %v1451_v45 = vld [vmem:[%s2163_s3 + $0xb8] sm:$0xff]  ;;  %s431_s24 = scalar_lea.vmem [#allocation2], %s1424_s15  ;;  %s1615_s15 = scalar_lea.hbm %s2173_s13, 16 }
  0x1d   : > { %v440_v1 = vsel %vm439_vm0, %v1783_v0, 0.0  ;;  %502 = vmatpush.msra.mxu1 %v478_v18  ;;  %v1443_v27 = vld [vmem:[%s2163_s3 + $0x28] sm:$0xff]  ;;  %v1427_v30 = vld [vmem:[%s2163_s3 + $0x80] sm:$0xff]  ;;  %v1457_v46 = vld [vmem:[%s2163_s3 + $0x138] sm:$0xff]  ;;  %s1358_s0 = sshll.u32 %s431_s24, 4  ;;  %s1359_s0 = int_to_ptr.vmem [resolvable:$true] %s1358_s0 }
  0x1e   : > { %441 = vadd.xlane.f32.xlu0 %v440_v1  ;;  %562 = vmatpush.msra.mxu2 %v1434_v19  ;;  %v1442_v31 = vld [vmem:[%s2163_s3 + $0x20] sm:$0xff]  ;;  %v1450_v47 = vld [vmem:[%s2163_s3 + $0xb0] sm:$0xff]  ;;  %v1449_v49 = vld [vmem:[%s2163_s3 + $0xa8] sm:$0xff] }
  0x1f   : > { %v1574_v3 = vpop.eup %1573  ;;  %503 = vmatpush.msra.mxu1 %v477_v20  ;;  %v1554_v39 = vld [vmem:[%s2181_s1] ss:$0 sm:$0xff]  ;;  %v1456_v48 = vld [vmem:[%s2163_s3 + $0x130] sm:$0xff]  ;;  %v1455_v50 = vld [vmem:[%s2163_s3 + $0x128] sm:$0xff] }
  0x20   : > { %v444_v4 = vmul.f32 32.0, %v1574_v3  ;;  %vm448_vm1 = vweird.f32 %v1574_v3  ;;  %563 = vmatpush.msra.mxu2 %v1433_v21  ;;  %v1555_v41 = vld [vmem:[%s2182_s2] ss:$0 sm:$0xff]  ;;  %v1558_v54 = vld [vmem:[%s2164_s4 + $0x4] ss:$0 sm:$0xff]  ;;  %s1609_s2 = sshra.s32 %s1361_s17, 4  ;;  %s1610_s2 = int_to_ptr.hbm [resolvable:$true] %s1609_s2 }
  0x21   : > { %530 = vmatpush.msrb.mxu1 %v1430_v22  ;;  %v1448_v51 = vld [vmem:[%s2163_s3 + $0xa0] sm:$0xff]  ;;  %v1557_v55 = vld [vmem:[%s2164_s4 + $0x8] ss:$0 sm:$0xff]  ;;  %s1611_s20 = scalar_lea.hbm %s1610_s2, 8  ;;  %p1616_p0 = scmp.lt.s32.totalorder %s1610_s2, %s2173_s13 }
  0x22   : > { %v445_v5 = vsub.f32 1.0, %v444_v4  ;;  %666 = vmatpush.msrb.mxu2 %v1445_v23  ;;  %v1454_v52 = vld [vmem:[%s2163_s3 + $0x120] sm:$0xff]  ;;  %p1612_p11 = scmp.ne.s32.totalorder %s1610_s2, %s1611_s20  ;;  %p1617_p1 = scmp.lt.s32.totalorder %s1615_s15, %s1611_s20 }
  0x23   : > { %531 = vmatpush.msrb.mxu1 %v1429_v24  ;;  %v1556_v57 = vld [vmem:[%s2164_s4] ss:$0 sm:$0xff]  ;;  %v1560_v62 = vld [vmem:[%s2164_s4 + $0x5] ss:$0 sm:$0xff] }
  0x24   : > { %v446_v6 = vmul.f32 %v1574_v3, %v445_v5  ;;  %667 = vmatpush.msrb.mxu2 %v1444_v25  ;;  %p1613_p12 = pnand %p1612_p11, %p1768_p5  ;;  %p1618_p2 = por %p1617_p1, %p1616_p0 }
  0x25   : > { %532 = vmatpush.msrb.mxu1 %v1428_v26 }
  0x26   : > { %v447_v7 = vadd.f32 %v1574_v3, %v446_v6  ;;  %668 = vmatpush.msrb.mxu2 %v1443_v27  ;;  %v1468_v27 = vld [vmem:[%s2163_s3 + $0x58] sm:$0xff]  ;;  %p1614_p13 = pneg %p1613_p12 }
  0x27   : > { %533 = vmatpush.msrb.mxu1 %v1427_v30  ;;  %v1466_v30 = vld [vmem:[%s2163_s3 + $0x48] sm:$0xff] }
  0x28   : > { %v1787_v8 = vsel %vm448_vm1, %v1574_v3, %v447_v7  ;;  %669 = vmatpush.msrb.mxu2 %v1442_v31  ;;  %v1561_v3 = vld [vmem:[%s2164_s4 + $0x9] ss:$0 sm:$0xff]  ;;  %v1465_v31 = vld [vmem:[%s2163_s3 + $0x40] sm:$0xff]  ;;  %p1619_p3 = pnand %p1618_p2, %p1614_p13 }
  0x91   : > { %v442_v9 = vpop.xlane.xlu0 %441 }
  0x92   : > { %v450_v10 = vmul.f32 %v1787_v8, %v442_v9 }
  0x94   : > { %v451_v11 = vsub.f32 %v1783_v0, %v450_v10 }
  0x96   : > { %v452_v12 = vmul.f32 %v451_v11, %v451_v11 }
  0x98   : > { %v453_v13 = vsel %vm439_vm0, %v452_v12, 0.0 }
  0x99   : > { %454 = vadd.xlane.f32.xlu0 %v453_v13 }
 0x10c   : > { %v455_v28 = vpop.xlane.xlu0 %454 }
 0x10d   : > { %v456_v29 = vmul.f32 %v455_v28, %v1787_v8  ;;  %v1467_v28 = vld [vmem:[%s2163_s3 + $0x50] sm:$0xff] }
 0x10f   : > { %v457_v32 = vadd.f32 1e-05, %v456_v29  ;;  %v1559_v29 = vld [vmem:[%s2164_s4 + $0x1] ss:$0 sm:$0xff] }
 0x111   : > { %1575 = vrsqrt.f32 %v457_v32  ;;  %vm464_vm3 = vweird.f32 %v457_v32 }
 0x117   : > { %v1576_v33 = vpop.eup %1575 }
 0x118   : > { %v459_v34 = vmul.f32 %v1576_v33, %v457_v32  ;;  %vm465_vm2 = vweird.f32 %v1576_v33 }
 0x119   : > { %vm466_vm4 = vmor %vm464_vm3, %vm465_vm2 }
 0x11a   : > { %v460_v35 = vmul.f32 %v1576_v33, %v459_v34 }
 0x11c   : > { %v461_v36 = vmul.f32 0.5, %v460_v35 }
 0x11e   : > { %v462_v37 = vsub.f32 1.5, %v461_v36 }
 0x120   : > { %v463_v38 = vmul.f32 %v1576_v33, %v462_v37 }
 0x122   : > { %v467_v40 = vsel %vm466_vm4, %v1576_v33, %v463_v38  ;;  %v643_v33 = vld [vmem:[%s2165_s5] sm:$0xff] }
 0x123   : > { %v468_v42 = vmul.f32 %v467_v40, %v451_v11 }
 0x125   : > { %v472_v43 = vmul.f32 %v1554_v39, %v468_v42 }
 0x127   : > { %v1847_v44 = vadd.f32 %v1555_v41, %v472_v43  ;;  %v1474_v43 = vld [vmem:[%s2163_s3 + $0xd8] sm:$0xff] }
 0x129   : > { %1426 = vmatmul.msk.f32.vlgmr.msra.gmra.mxu1 %vm439_vm0, %v1847_v44  ;;  %1438 = vmatmul.msk.f32.vlgmr.msra.gmra.mxu2 %vm439_vm0, %v1847_v44 }
 0x12a   : > { %696 = vmatpush.msra.mxu1 %v1451_v45  ;;  %726 = vmatpush.msra.mxu2 %v1457_v46  ;;  %v1473_v45 = vld [vmem:[%s2163_s3 + $0xd0] sm:$0xff]  ;;  %v1472_v46 = vld [vmem:[%s2163_s3 + $0xc8] sm:$0xff] }
 0x12c   : > { %697 = vmatpush.msra.mxu1 %v1450_v47  ;;  %727 = vmatpush.msra.mxu2 %v1456_v48  ;;  %v1471_v47 = vld [vmem:[%s2163_s3 + $0xc0] sm:$0xff] }
 0x12e   : > { %698 = vmatpush.msra.mxu1 %v1449_v49  ;;  %728 = vmatpush.msra.mxu2 %v1455_v50 }
 0x130   : > { %699 = vmatpush.msra.mxu1 %v1448_v51  ;;  %729 = vmatpush.msra.mxu2 %v1454_v52 }
 0x131   : > { %1432 = vmatmul.msk.f32.vlgmr.msrb.gmra.mxu1 %vm439_vm0, %v1847_v44  ;;  %1447 = vmatmul.msk.f32.vlgmr.msrb.gmra.mxu2 %vm439_vm0, %v1847_v44 }
 0x132   : > { %850 = vmatpush.msrb.mxu2 %v643_v33 }
 0x139   : > { %1453 = vmatmul.msk.f32.vlgmr.msra.gmra.mxu1 %vm439_vm0, %v1847_v44  ;;  %1459 = vmatmul.msk.f32.vlgmr.msra.gmra.mxu2 %vm439_vm0, %v1847_v44 }
 0x1a6   : > { %v505_v53 = vpop.f32.mrf.mxu1 }
 0x1a7   : > { %v506_v61 = vadd.f32 %v1556_v57, %v505_v53 }
 0x1ac   : > { %v565_v56 = vpop.f32.mrf.mxu2 }
 0x1ad   : > { %v566_v60 = vadd.f32 %v1557_v55, %v565_v56 }
 0x1ae   : > { %v535_v58 = vpop.f32.mrf.mxu1 }
 0x1af   : > { %v536_v59 = vadd.f32 %v1558_v54, %v535_v58 }
 0x1b1   : > { %1439 = vmatpush.xpose.msk.msra.mxu3 %vm568_vm5, %v536_v59 }
 0x1b4   : > { %1440 = vmatmul.msk.f32.vlgmr.msra.gmra.mxu3 %vm568_vm5, %v506_v61  ;;  %v671_v63 = vpop.f32.mrf.mxu2  ;;  %v1480_v61 = vld [vmem:[%s2163_s3 + $0x158] sm:$0xff] }
 0x1b5   : > { %638 = vmatpush.msrb.mxu3 %v566_v60  ;;  %v672_v32 = vadd.f32 %v1559_v29, %v671_v63  ;;  %v808_v60 = vld [vmem:[%s2165_s5 + $0x8] sm:$0xff] }
 0x1b6   : > { %v701_v1 = vpop.f32.mrf.mxu1  ;;  %827 = vmatpush.msrb.mxu1 %v808_v60  ;;  %v1478_v63 = vld [vmem:[%s2163_s3 + $0x148] sm:$0xff] }
 0x1b7   : > { %v702_v2 = vadd.f32 %v1560_v62, %v701_v1  ;;  %v1479_v62 = vld [vmem:[%s2163_s3 + $0x150] sm:$0xff]  ;;  %v1477_v1 = vld [vmem:[%s2163_s3 + $0x140] sm:$0xff] }
 0x1b8   : > { %937 = vmatpush.msra.mxu1 %v1480_v61 }
 0x1b9   : > { %1460 = vmatpush.xpose.msk.msra.mxu3 %vm568_vm5, %v702_v2  ;;  %v1490_v2 = vld [vmem:[%s2163_s3 + $0x78] sm:$0xff] }
 0x1ba   : > { %938 = vmatpush.msra.mxu1 %v1479_v62 }
 0x1bc   : > { %v731_v4 = vpop.f32.mrf.mxu2  ;;  %939 = vmatpush.msra.mxu1 %v1478_v63 }
 0x1bd   : > { %v732_v5 = vadd.f32 %v1561_v3, %v731_v4  ;;  %v1489_v4 = vld [vmem:[%s2163_s3 + $0x70] sm:$0xff] }
 0x1be   : > { %940 = vmatpush.msra.mxu1 %v1477_v1 }
 0x1bf   : > { %803 = vmatpush.msra.mxu0 %v732_v5  ;;  %v1488_v5 = vld [vmem:[%s2163_s3 + $0x68] sm:$0xff] }
 0x1c1   : > { %907 = vmatpush.msrb.mxu0 %v1474_v43 }
 0x1c3   : > { %908 = vmatpush.msrb.mxu0 %v1473_v45 }
 0x1c5   : > { %909 = vmatpush.msrb.mxu0 %v1472_v46 }
 0x1c7   : > { %910 = vmatpush.msrb.mxu0 %v1471_v47 }
 0x237   : > { %v592_v6 = vpop.f32.mrf.mxu3 }
 0x238   : > { %v595_v7 = vmul.f32 0.35355338, %v592_v6  ;;  %v1563_v6 = vld [vmem:[%s2164_s4 + $0x6] ss:$0 sm:$0xff] }
 0x23a   : > { %v596_v9 = vsel %vm568_vm5, %v595_v7, -inf }
 0x23b   : > { %597 = vmax.xlane.f32.xlu1 %v596_v9  ;;  %v1562_v9 = vld [vmem:[%s2164_s4 + $0x2] ss:$0 sm:$0xff] }
 0x2ae   : > { %v598_v10 = vpop.xlane.xlu1 %597 }
 0x2af   : > { %v599_v11 = vsub.f32 %v595_v7, %v598_v10  ;;  %v1487_v7 = vld [vmem:[%s2163_s3 + $0x60] sm:$0xff] }
 0x2b1   : > { %v600_v12 = vmul.f32 1.442695, %v599_v11 }
 0x2b3   : > { %1577 = vpow2.f32 %v600_v12 }
 0x2b9   : > { %v1578_v13 = vpop.eup %1577 }
 0x2ba   : > { %v602_v14 = vsel %vm568_vm5, %v1578_v13, 0.0 }
 0x2bb   : > { %603 = vadd.xlane.f32.xlu1 %v602_v14 }
 0x32e   : > { %v604_v15 = vpop.xlane.xlu1 %603 }
 0x32f   : > { %1579 = vrcp.f32 %v604_v15  ;;  %v616_v19 = vand.u32 2147483648, %v604_v15  ;;  %v614_v21 = vand.u32 2147483647, %v604_v15  ;;  %vm610_vm7 = vweird.f32 %v604_v15 }
 0x331   : > { %v617_v23 = vor.u32 1.1754944e-38, %v616_v19  ;;  %vm615_vm9 = vcmp.eq.f32.partialorder %v614_v21, 8.507059e+37 }
 0x335   : > { %v1580_v16 = vpop.eup %1579 }
 0x336   : > { %v606_v17 = vmul.f32 %v1580_v16, %v604_v15  ;;  %vm611_vm6 = vweird.f32 %v1580_v16  ;;  %v1495_v15 = vld [vmem:[%s2163_s3 + $0xf0] sm:$0xff] }
 0x337   : > { %vm612_vm8 = vmor %vm610_vm7, %vm611_vm6 }
 0x338   : > { %v607_v18 = vsub.f32 1.0, %v606_v17  ;;  %v1493_v17 = vld [vmem:[%s2163_s3 + $0xe0] sm:$0xff] }
 0x33a   : > { %v608_v20 = vmul.f32 %v1580_v16, %v607_v18  ;;  %v1019_v18 = vld [vmem:[%s2165_s5 + $0x10] sm:$0xff] }
 0x33c   : > { %v609_v22 = vadd.f32 %v1580_v16, %v608_v20 }
 0x33e   : > { %v613_v24 = vsel %vm612_vm8, %v1580_v16, %v609_v22  ;;  %v1494_v16 = vld [vmem:[%s2163_s3 + $0xe8] sm:$0xff] }
 0x33f   : > { %v618_v25 = vsel %vm615_vm9, %v617_v23, %v613_v24  ;;  %v1564_v22 = vld [vmem:[%s2164_s4 + $0xa] ss:$0 sm:$0xff] }
 0x340   : > { %v619_v26 = vmul.f32 %v1578_v13, %v618_v25  ;;  %v1496_v13 = vld [vmem:[%s2163_s3 + $0xf8] sm:$0xff] }
 0x342   : > { %1441 = vmatmul.msk.f32.vlgmr.msrb.gmra.mxu3 %vm568_vm5, %v619_v26 }
 0x343   : > { %877 = vmatpush.msrb.mxu3 %v1468_v27 }
 0x345   : > { %878 = vmatpush.msrb.mxu3 %v1467_v28  ;;  %v1566_v28 = vld [vmem:[%s2164_s4 + $0x7] ss:$0 sm:$0xff] }
 0x347   : > { %879 = vmatpush.msrb.mxu3 %v1466_v30 }
 0x349   : > { %880 = vmatpush.msrb.mxu3 %v1465_v31 }
 0x34a   : > { %1461 = vmatmul.msk.f32.vlgmr.msra.gmra.mxu3 %vm568_vm5, %v672_v32 }
 0x352   : > { %1470 = vmatmul.msk.f32.vlgmr.msrb.gmra.mxu3 %vm439_vm0, %v1847_v44 }
 0x3c5   : > { %v640_v34 = vpop.f32.mrf.mxu3 }
 0x3c6   : > { %1464 = vmatmul.msk.f32.vlgmr.msrb.gmra.mxu2 %vm568_vm5, %v640_v34 }
 0x3cd   : > { %v757_v35 = vpop.f32.mrf.mxu3 }
 0x3ce   : > { %v760_v36 = vmul.f32 0.35355338, %v757_v35 }
 0x3d0   : > { %v761_v37 = vsel %vm568_vm5, %v760_v36, -inf }
 0x3d1   : > { %762 = vmax.xlane.f32.xlu2 %v761_v37  ;;  %v1501_v37 = vld [vmem:[%s2163_s3 + $0x170] sm:$0xff] }
 0x3d5   : > { %v882_v11 = vpop.f32.mrf.mxu3 }
 0x3d6   : > { %v883_v14 = vadd.f32 %v1562_v9, %v882_v11 }
 0x444   : > { %v763_v38 = vpop.xlane.xlu2 %762 }
 0x445   : > { %v764_v39 = vsub.f32 %v760_v36, %v763_v38  ;;  %v1502_v36 = vld [vmem:[%s2163_s3 + $0x178] sm:$0xff]  ;;  %v1500_v38 = vld [vmem:[%s2163_s3 + $0x168] sm:$0xff] }
 0x447   : > { %v765_v40 = vmul.f32 1.442695, %v764_v39  ;;  %v1499_v39 = vld [vmem:[%s2163_s3 + $0x160] sm:$0xff] }
 0x449   : > { %1581 = vpow2.f32 %v765_v40  ;;  %v852_v19 = vpop.f32.mrf.mxu2 }
 0x44f   : > { %v1582_v41 = vpop.eup %1581 }
 0x450   : > { %v767_v42 = vsel %vm568_vm5, %v1582_v41, 0.0 }
 0x451   : > { %768 = vadd.xlane.f32.xlu2 %v767_v42 }
 0x4c4   : > { %v769_v48 = vpop.xlane.xlu2 %768 }
 0x4c5   : > { %1583 = vrcp.f32 %v769_v48  ;;  %v781_v52 = vand.u32 2147483648, %v769_v48  ;;  %v779_v54 = vand.u32 2147483647, %v769_v48  ;;  %vm775_vm11 = vweird.f32 %v769_v48 }
 0x4c7   : > { %v782_v56 = vor.u32 1.1754944e-38, %v781_v52  ;;  %vm780_vm13 = vcmp.eq.f32.partialorder %v779_v54, 8.507059e+37  ;;  %v1565_v54 = vld [vmem:[%s2164_s4 + $0x3] ss:$0 sm:$0xff] }
 0x4cb   : > { %v1584_v49 = vpop.eup %1583 }
 0x4cc   : > { %v771_v50 = vmul.f32 %v1584_v49, %v769_v48  ;;  %vm776_vm10 = vweird.f32 %v1584_v49 }
 0x4cd   : > { %vm777_vm12 = vmor %vm775_vm11, %vm776_vm10 }
 0x4ce   : > { %v772_v51 = vsub.f32 1.0, %v771_v50 }
 0x4d0   : > { %v773_v53 = vmul.f32 %v1584_v49, %v772_v51 }
 0x4d2   : > { %v774_v55 = vadd.f32 %v1584_v49, %v773_v53 }
 0x4d4   : > { %v778_v57 = vsel %vm777_vm12, %v1584_v49, %v774_v55 }
 0x4d5   : > { %v783_v58 = vsel %vm780_vm13, %v782_v56, %v778_v57  ;;  %v1567_v56 = vld [vmem:[%s2164_s4 + $0xb] ss:$0 sm:$0xff] }
 0x4d6   : > { %v784_v59 = vmul.f32 %v1582_v41, %v783_v58 }
 0x4d8   : > { %1462 = vmatmul.msk.f32.vlgmr.msra.gmra.mxu0 %vm568_vm5, %v784_v59 }
 0x4d9   : > { %1038 = vmatpush.msra.mxu0 %v1019_v18 }
 0x4e0   : > { %1476 = vmatmul.msk.f32.vlgmr.msrb.gmra.mxu0 %vm439_vm0, %v1847_v44 }
 0x555   : > { %v805_v3 = vpop.f32.mrf.mxu0 }
 0x556   : > { %1463 = vmatmul.msk.f32.vlgmr.msrb.gmra.mxu1 %vm568_vm5, %v805_v3 }
 0x557   : > { %1066 = vmatpush.msrb.mxu1 %v1490_v2 }
 0x559   : > { %1067 = vmatpush.msrb.mxu1 %v1489_v4 }
 0x55b   : > { %1068 = vmatpush.msrb.mxu1 %v1488_v5 }
 0x55d   : > { %v912_v10 = vpop.f32.mrf.mxu0  ;;  %1069 = vmatpush.msrb.mxu1 %v1487_v7 }
 0x55e   : > { %v913_v12 = vadd.f32 %v1563_v6, %v912_v10  ;;  %1482 = vmatmul.msk.f32.vlgmr.msra.gmra.mxu1 %vm439_vm0, %v1847_v44  ;;  %v1208_v6 = vld [vmem:[%s2165_s5 + $0x18] sm:$0xff] }
 0x560   : > { %1483 = vmatpush.xpose.msk.msra.mxu2 %vm568_vm5, %v913_v12 }
 0x563   : > { %1484 = vmatmul.msk.f32.vlgmr.msra.gmra.mxu2 %vm568_vm5, %v883_v14 }
 0x564   : > { %1096 = vmatpush.msrb.mxu2 %v1496_v13 }
 0x566   : > { %1097 = vmatpush.msrb.mxu2 %v1495_v15  ;;  %1492 = vmatmul.msk.f32.vlgmr.msrb.gmra.mxu1 %vm439_vm0, %v1847_v44 }
 0x568   : > { %1098 = vmatpush.msrb.mxu2 %v1494_v16 }
 0x56a   : > { %1099 = vmatpush.msrb.mxu2 %v1493_v17 }
 0x56b   : > { %1498 = vmatmul.msk.f32.vlgmr.msrb.gmra.mxu2 %vm439_vm0, %v1847_v44 }
 0x56c   : > { %1227 = vmatpush.msra.mxu2 %v1208_v6  ;;  %v1572_v6 = vld [vmem:[%s2172_s12] ss:$0 sm:$0xff] }
 0x5d3   : > { %v829_v20 = vpop.f32.mrf.mxu1 }
 0x5d4   : > { %v853_v21 = vadd.f32 %v852_v19, %v829_v20 }
 0x5db   : > { %v942_v23 = vpop.f32.mrf.mxu1 }
 0x5dc   : > { %v943_v24 = vadd.f32 %v1564_v22, %v942_v23 }
 0x5de   : > { %1014 = vmatpush.msra.mxu3 %v943_v24 }
 0x5e0   : > { %1126 = vmatpush.msrb.mxu3 %v1502_v36  ;;  %v1317_v36 = vld [vmem:[%s2171_s11 + $0x70] sm:$0xff] }
 0x5e2   : > { %1127 = vmatpush.msrb.mxu3 %v1501_v37  ;;  %v1316_v37 = vld [vmem:[%s2171_s11 + $0x68] sm:$0xff] }
 0x5e3   : > { %v1071_v55 = vpop.f32.mrf.mxu1 }
 0x5e4   : > { %1128 = vmatpush.msrb.mxu3 %v1500_v38  ;;  %v1072_v57 = vadd.f32 %v1565_v54, %v1071_v55  ;;  %v1306_v55 = vld [vmem:[%s2171_s11 + $0x18] sm:$0xff] }
 0x5e6   : > { %v968_v25 = vpop.f32.mrf.mxu2  ;;  %1129 = vmatpush.msrb.mxu3 %v1499_v39 }
 0x5e7   : > { %v971_v26 = vmul.f32 0.35355338, %v968_v25 }
 0x5e9   : > { %v972_v27 = vsel %vm568_vm5, %v971_v26, -inf }
 0x5ea   : > { %973 = vmax.xlane.f32.xlu0 %v972_v27 }
 0x5ee   : > { %v1101_v29 = vpop.f32.mrf.mxu2 }
 0x5ef   : > { %v1102_v30 = vadd.f32 %v1566_v28, %v1101_v29 }
 0x5f1   : > { %1505 = vmatpush.xpose.msk.msrb.mxu0 %vm568_vm5, %v1102_v30 }
 0x65d   : > { %v974_v31 = vpop.xlane.xlu0 %973 }
 0x65e   : > { %v975_v32 = vsub.f32 %v971_v26, %v974_v31 }
 0x660   : > { %v976_v33 = vmul.f32 1.442695, %v975_v32  ;;  %v1274_v32 = vld [vmem:[%s2169_s9 + $0x18] sm:$0xff] }
 0x662   : > { %1585 = vpow2.f32 %v976_v33  ;;  %v1272_v33 = vld [vmem:[%s2169_s9 + $0x8] sm:$0xff] }
 0x668   : > { %v1586_v34 = vpop.eup %1585 }
 0x669   : > { %v978_v35 = vsel %vm568_vm5, %v1586_v34, 0.0 }
 0x66a   : > { %979 = vadd.xlane.f32.xlu1 %v978_v35  ;;  %v1318_v35 = vld [vmem:[%s2171_s11 + $0x78] sm:$0xff] }
 0x6dd   : > { %v980_v40 = vpop.xlane.xlu1 %979 }
 0x6de   : > { %1587 = vrcp.f32 %v980_v40  ;;  %v992_v45 = vand.u32 2147483648, %v980_v40  ;;  %v990_v47 = vand.u32 2147483647, %v980_v40  ;;  %vm986_vm15 = vweird.f32 %v980_v40 }
 0x6e0   : > { %v993_v49 = vor.u32 1.1754944e-38, %v992_v45  ;;  %vm991_vm2 = vcmp.eq.f32.partialorder %v990_v47, 8.507059e+37  ;;  %v1311_v45 = vld [vmem:[%s2171_s11 + $0x40] sm:$0xff]  ;;  %v1310_v47 = vld [vmem:[%s2171_s11 + $0x38] sm:$0xff] }
 0x6e4   : > { %v1588_v41 = vpop.eup %1587 }
 0x6e5   : > { %v982_v42 = vmul.f32 %v1588_v41, %v980_v40  ;;  %vm987_vm14 = vweird.f32 %v1588_v41  ;;  %v1315_v40 = vld [vmem:[%s2171_s11 + $0x60] sm:$0xff] }
 0x6e6   : > { %vm988_vm1 = vmor %vm986_vm15, %vm987_vm14 }
 0x6e7   : > { %v983_v43 = vsub.f32 1.0, %v982_v42  ;;  %v1314_v42 = vld [vmem:[%s2171_s11 + $0x58] sm:$0xff] }
 0x6e9   : > { %v984_v46 = vmul.f32 %v1588_v41, %v983_v43  ;;  %v1313_v43 = vld [vmem:[%s2171_s11 + $0x50] sm:$0xff] }
 0x6eb   : > { %v985_v48 = vadd.f32 %v1588_v41, %v984_v46 }
 0x6ed   : > { %v989_v50 = vsel %vm988_vm1, %v1588_v41, %v985_v48 }
 0x6ee   : > { %v994_v51 = vsel %vm991_vm2, %v993_v49, %v989_v50  ;;  %v1309_v49 = vld [vmem:[%s2171_s11 + $0x30] sm:$0xff] }
 0x6ef   : > { %v995_v52 = vmul.f32 %v1586_v34, %v994_v51  ;;  %v1271_v34 = vld [vmem:[%s2169_s9] sm:$0xff]  ;;  %v1308_v51 = vld [vmem:[%s2171_s11 + $0x28] sm:$0xff] }
 0x6f1   : > { %1485 = vmatmul.msk.f32.vlgmr.msra.gmra.mxu3 %vm568_vm5, %v995_v52 }
 0x6f2   : > { %1294 = vmatpush.msra.mxu3 %v1274_v32 }
 0x6f9   : > { %1504 = vmatmul.msk.f32.vlgmr.msrb.gmra.mxu3 %vm439_vm0, %v1847_v44 }
 0x774   : > { %v1016_v53 = vpop.f32.mrf.mxu3 }
 0x775   : > { %1486 = vmatmul.msk.f32.vlgmr.msra.gmra.mxu0 %vm568_vm5, %v1016_v53  ;;  %v1307_v53 = vld [vmem:[%s2171_s11 + $0x20] sm:$0xff] }
 0x776   : > { %1323 = vmatpush.msra.mxu0 %v1318_v35 }
 0x778   : > { %1324 = vmatpush.msra.mxu0 %v1317_v36 }
 0x77a   : > { %1325 = vmatpush.msra.mxu0 %v1316_v37 }
 0x77c   : > { %v1131_v58 = vpop.f32.mrf.mxu3  ;;  %1326 = vmatpush.msra.mxu0 %v1315_v40 }
 0x77d   : > { %v1132_v59 = vadd.f32 %v1567_v56, %v1131_v58  ;;  %1506 = vmatmul.msk.f32.vlgmr.msrb.gmra.mxu0 %vm568_vm5, %v1072_v57  ;;  %v1569_v57 = vld [vmem:[%s2167_s7] ss:$0 sm:$0xff] }
 0x77e   : > { %1327 = vmatpush.msra.mxu0 %v1314_v42 }
 0x77f   : > { %1203 = vmatpush.msra.mxu1 %v1132_v59 }
 0x780   : > { %1328 = vmatpush.msra.mxu0 %v1313_v43 }
 0x7f2   : > { %v1040_v60 = vpop.f32.mrf.mxu0 }
 0x7f3   : > { %v1043_v44 = vadd.f32 %v1040_v60, %v853_v21  ;;  %v1568_v21 = vld [vmem:[%s2166_s6] ss:$0 sm:$0xff] }
 0x7f4   : > { %v1570_v60 = vld [vmem:[%s2168_s8] ss:$0 sm:$0xff] }
 0x7fa   : > { %v1157_v61 = vpop.f32.mrf.mxu0 }
 0x7fb   : > { %v1160_v62 = vmul.f32 0.35355338, %v1157_v61 }
 0x7fd   : > { %v1161_v63 = vsel %vm568_vm5, %v1160_v62, -inf }
 0x7fe   : > { %1162 = vmax.xlane.f32.xlu2 %v1161_v63  ;;  %v1304_v63 = vld [vmem:[%s2171_s11 + $0x8] sm:$0xff] }
 0x871   : > { %v1163_v1 = vpop.xlane.xlu2 %1162 }
 0x872   : > { %v1164_v2 = vsub.f32 %v1160_v62, %v1163_v1  ;;  %v1305_v62 = vld [vmem:[%s2171_s11 + $0x10] sm:$0xff]  ;;  %v1303_v1 = vld [vmem:[%s2171_s11] sm:$0xff] }
 0x874   : > { %v1165_v3 = vmul.f32 1.442695, %v1164_v2  ;;  %v1571_v2 = vld [vmem:[%s2170_s10] ss:$0 sm:$0xff] }
 0x876   : > { %1589 = vpow2.f32 %v1165_v3 }
 0x87c   : > { %v1590_v4 = vpop.eup %1589 }
 0x87d   : > { %v1167_v5 = vsel %vm568_vm5, %v1590_v4, 0.0 }
 0x87e   : > { %1168 = vadd.xlane.f32.xlu0 %v1167_v5 }
 0x8f1   : > { %v1169_v7 = vpop.xlane.xlu0 %1168 }
 0x8f2   : > { %1591 = vrcp.f32 %v1169_v7  ;;  %v1181_v12 = vand.u32 2147483648, %v1169_v7  ;;  %v1179_v14 = vand.u32 2147483647, %v1169_v7  ;;  %vm1175_vm4 = vweird.f32 %v1169_v7 }
 0x8f4   : > { %v1182_v16 = vor.u32 1.1754944e-38, %v1181_v12  ;;  %vm1180_vm7 = vcmp.eq.f32.partialorder %v1179_v14, 8.507059e+37 }
 0x8f8   : > { %v1592_v9 = vpop.eup %1591 }
 0x8f9   : > { %v1171_v10 = vmul.f32 %v1592_v9, %v1169_v7  ;;  %vm1176_vm3 = vweird.f32 %v1592_v9 }
 0x8fa   : > { %vm1177_vm6 = vmor %vm1175_vm4, %vm1176_vm3 }
 0x8fb   : > { %v1172_v11 = vsub.f32 1.0, %v1171_v10 }
 0x8fd   : > { %v1173_v13 = vmul.f32 %v1592_v9, %v1172_v11 }
 0x8ff   : > { %v1174_v15 = vadd.f32 %v1592_v9, %v1173_v13 }
 0x901   : > { %v1178_v17 = vsel %vm1177_vm6, %v1592_v9, %v1174_v15 }
 0x902   : > { %v1183_v18 = vsel %vm1180_vm7, %v1182_v16, %v1178_v17 }
 0x903   : > { %v1184_v19 = vmul.f32 %v1590_v4, %v1183_v18 }
 0x905   : > { %1507 = vmatmul.msk.f32.vlgmr.msra.gmra.mxu1 %vm568_vm5, %v1184_v19 }
 0x982   : > { %v1205_v20 = vpop.f32.mrf.mxu1 }
 0x983   : > { %1508 = vmatmul.msk.f32.vlgmr.msra.gmra.mxu2 %vm568_vm5, %v1205_v20 }
 0xa06   : > { %v1229_v22 = vpop.f32.mrf.mxu2 }
 0xa07   : > { %v1232_v23 = vadd.f32 %v1229_v22, %v1043_v44 }
 0xa09   : > { %v1237_v24 = vadd.f32 %v1568_v21, %v1232_v23 }
 0xa0b   : > { %v2045_v25 = vadd.f32 %v1237_v24, %v1783_v0  ;;  %v1273_v0 = vld [vmem:[%s2169_s9 + $0x10] sm:$0xff] }
 0xa0c   : > { %1295 = vmatpush.msra.mxu3 %v1273_v0 }
 0xa0d   : > { %v1241_v26 = vsel %vm439_vm0, %v2045_v25, 0.0 }
 0xa0e   : > { %1242 = vadd.xlane.f32.xlu1 %v1241_v26  ;;  %1296 = vmatpush.msra.mxu3 %v1272_v33 }
 0xa10   : > { %1297 = vmatpush.msra.mxu3 %v1271_v34 }
 0xa81   : > { %v1243_v27 = vpop.xlane.xlu1 %1242 }
 0xa82   : > { %v1244_v28 = vmul.f32 %v1243_v27, %v1787_v8 }
 0xa84   : > { %v1245_v29 = vsub.f32 %v2045_v25, %v1244_v28 }
 0xa86   : > { %v1246_v30 = vmul.f32 %v1245_v29, %v1245_v29 }
 0xa88   : > { %v1247_v31 = vsel %vm439_vm0, %v1246_v30, 0.0 }
 0xa89   : > { %1248 = vadd.xlane.f32.xlu2 %v1247_v31 }
 0xafc   : > { %v1249_v38 = vpop.xlane.xlu2 %1248 }
 0xafd   : > { %v1250_v39 = vmul.f32 %v1249_v38, %v1787_v8  ;;  %v1312_v8 = vld [vmem:[%s2171_s11 + $0x48] sm:$0xff] }
 0xafe   : > { %1329 = vmatpush.msra.mxu0 %v1312_v8 }
 0xaff   : > { %v1251_v41 = vadd.f32 1e-05, %v1250_v39 }
 0xb00   : > { %1330 = vmatpush.msra.mxu0 %v1311_v45 }
 0xb01   : > { %1593 = vrsqrt.f32 %v1251_v41  ;;  %vm1258_vm8 = vweird.f32 %v1251_v41 }
 0xb02   : > { %1331 = vmatpush.msra.mxu0 %v1310_v47 }
 0xb04   : > { %1332 = vmatpush.msra.mxu0 %v1309_v49 }
 0xb06   : > { %1333 = vmatpush.msra.mxu0 %v1308_v51 }
 0xb07   : > { %v1594_v46 = vpop.eup %1593 }
 0xb08   : > { %v1253_v48 = vmul.f32 %v1594_v46, %v1251_v41  ;;  %vm1259_vm5 = vweird.f32 %v1594_v46  ;;  %1334 = vmatpush.msra.mxu0 %v1307_v53 }
 0xb09   : > { %vm1260_vm9 = vmor %vm1258_vm8, %vm1259_vm5 }
 0xb0a   : > { %v1254_v50 = vmul.f32 %v1594_v46, %v1253_v48  ;;  %1335 = vmatpush.msra.mxu0 %v1306_v55 }
 0xb0c   : > { %v1255_v52 = vmul.f32 0.5, %v1254_v50  ;;  %1336 = vmatpush.msra.mxu0 %v1305_v62 }
 0xb0e   : > { %v1256_v54 = vsub.f32 1.5, %v1255_v52  ;;  %1337 = vmatpush.msra.mxu0 %v1304_v63 }
 0xb10   : > { %v1257_v56 = vmul.f32 %v1594_v46, %v1256_v54  ;;  %1338 = vmatpush.msra.mxu0 %v1303_v1 }
 0xb12   : > { %v1261_v58 = vsel %vm1260_vm9, %v1594_v46, %v1257_v56 }
 0xb13   : > { %v1262_v59 = vmul.f32 %v1261_v58, %v1245_v29 }
 0xb15   : > { %v1266_v44 = vmul.f32 %v1569_v57, %v1262_v59 }
 0xb17   : > { %v1270_v61 = vadd.f32 %v1570_v60, %v1266_v44 }
 0xb19   : > { %1509 = vmatmul.msk.f32.vlgmr.msra.gmra.mxu3 %vm439_vm0, %v1270_v61 }
 0xb9c   : > { %v1299_v3 = vpop.f32.mrf.mxu3 }
 0xb9d   : > { %v1300_v4 = vadd.f32 %v1571_v2, %v1299_v3 }
 0xb9f   : > { %v1302_v5 = vmax.f32 %v1300_v4, 0.0 }
 0xba1   : > { %1339 = vmatmul.f32.vlgmr.msra.gmra.mxu0 %v1302_v5 }
 0xc1e   : > { %v1340_v7 = vpop.f32.mrf.mxu0 }
 0xc1f   : > { %v1341_v9 = vadd.f32 %v1572_v6, %v1340_v7 }
 0xc21   : > { %v1343_v10 = vadd.f32 %v1341_v9, %v2045_v25 }
 0xc23   : > { %1344 = vst.msk [vmem:[%s431_s24] sm:$0xff] %vm439_vm0, %v1343_v10 }
 0xc24   : > { %1622 = shalt.err (!%p1619_p3)
}
 0xc25   : > { %1514 = dma.vmem_to_hbm [thread:$0]  (%p1768_p5), %s1359_s0, 128, %s1361_s17, %s1346_s29  }
 0xc26 PF: > { %p1520_p4 = scmp.ge.s32.totalorder %s1657_s28, 2  ;;  %s1372_s30 = sand.u32 1, %s1645_s25  }
 0xc27   : > { %s1373_s23 = scalar_lea.sflag [#allocation3], %s1372_s30 }
 0xc28   : > { %p1517_p7 = pnand %p1520_p4, %p1772_p6 }
 0xc2a   : > { %p1518_p8 = pneg %p1517_p7 }
 0xc2c   : > { %1640 = dma.done.wait (%p1518_p8), %s1373_s23, 128  }
 0xc2d   : > { %1642 = vsyncadd (%p1518_p8), %s1373_s23, 4294967168  ;;  %s2183_s2 = sld [smem:[#allocation5_spill]]  ;;  %p23_p9 = scmp.ge.s32.totalorder %s1755_s14, 4  }
 0xc2e   : > { %s2184_s25 = smov %s1649_s26  ;;  %s2185_s26 = smov %s1653_s27 }
 0xc2f   : > { %s2187_s28 = smov %s1755_s14  ;;  %25 = sbr.rel (!%p23_p9) target bundleno = 7 (0x7), region = 129 }
 0xc33   : > { %s2186_s27 = smov %s2183_s2 }
 0xc34   :  { %1379 = vsyncpa [#allocation3], 1 }
 0xc35   :  { %1381 = vsyncpa [#allocation3 + $0x1], 1 }

</bundles_post_ra>
